<compile_context>
chip_gen: v6e
topology: v6e:2x2x1
jax: 0.10.0
libtpu: 0.0.40
codegen_flags: <defaults>
</compile_context>

<pallas_src>
import math
from functools import partial

import jax
import jax.numpy as jnp
from jax.experimental import pallas as pl
from jax.experimental.pallas import tpu as pltpu

EPS = 1e-5
NEG_INF = -1e30


def _row_tile(r, cap=512):
    """Largest row tile <= cap that divides r (multiple of 8), else full r."""
    for t in (512, 256, 128, 64, 32, 16, 8):
        if t <= cap and t <= r and r % t == 0:
            return t
    return r


def _ln_f32(x, g, b):
    mean = jnp.mean(x, axis=-1, keepdims=True)
    var = jnp.mean((x - mean) ** 2, axis=-1, keepdims=True)
    return (x - mean) * jax.lax.rsqrt(var + EPS) * g + b


# --------------------- text projection + context layernorm -----------------

def _text_proj_ln_kernel(t5_ref, w_ref, g_ref, b_ref, o_ref):
    x = t5_ref[...].astype(jnp.bfloat16)
    y = jnp.dot(x, w_ref[...], preferred_element_type=jnp.float32)
    o_ref[...] = _ln_f32(y, g_ref[...], b_ref[...]).astype(o_ref.dtype)


def text_proj_ln(t5_2d, w_bf16, g, b):
    r, t5d = t5_2d.shape
    dim = w_bf16.shape[1]
    tm = _row_tile(r)
    return pl.pallas_call(
        _text_proj_ln_kernel,
        out_shape=jax.ShapeDtypeStruct((r, dim), jnp.bfloat16),
        grid=(r // tm,),
        in_specs=[
            pl.BlockSpec((tm, t5d), lambda i: (i, 0)),
            pl.BlockSpec((t5d, dim), lambda i: (0, 0)),
            pl.BlockSpec((1, dim), lambda i: (0, 0)),
            pl.BlockSpec((1, dim), lambda i: (0, 0)),
        ],
        out_specs=pl.BlockSpec((tm, dim), lambda i: (i, 0)),
        compiler_params=pltpu.CompilerParams(
            dimension_semantics=("parallel",)),
    )(t5_2d, w_bf16, g.reshape(1, dim), b.reshape(1, dim))


# --------------------------------- layernorm --------------------------------

def _ln_kernel(x_ref, g_ref, b_ref, o_ref):
    x = x_ref[...].astype(jnp.float32)
    o_ref[...] = _ln_f32(x, g_ref[...], b_ref[...]).astype(o_ref.dtype)


def layernorm(x2d, g, b):
    r, d = x2d.shape
    tm = _row_tile(r)
    return pl.pallas_call(
        _ln_kernel,
        out_shape=jax.ShapeDtypeStruct((r, d), x2d.dtype),
        grid=(r // tm,),
        in_specs=[pl.BlockSpec((tm, d), lambda i: (i, 0)),
                  pl.BlockSpec((1, d), lambda i: (0, 0)),
                  pl.BlockSpec((1, d), lambda i: (0, 0))],
        out_specs=pl.BlockSpec((tm, d), lambda i: (i, 0)),
        compiler_params=pltpu.CompilerParams(
            dimension_semantics=("parallel",)),
    )(x2d, g.reshape(1, d), b.reshape(1, d))


# -------------------- fused attention blocks (per batch) --------------------

def _mha(q, k, v, bias, wo_ref, n_heads, d_head, out_dim):
    # All heads of one batch element live in a single lane-dense [n, h*d]
    # block; per-head slices stay on-chip.  Output projection is accumulated
    # per head (sum_h attn_h @ wo[h]) to avoid an in-kernel concatenate.
    out = jnp.zeros((q.shape[0], out_dim), jnp.float32)
    for h in range(n_heads):
        lo = h * d_head
        qh = q[:, lo:lo + d_head].astype(jnp.bfloat16)
        kh = k[:, lo:lo + d_head].astype(jnp.bfloat16)
        vh = v[:, lo:lo + d_head].astype(jnp.bfloat16)
        s = jax.lax.dot_general(qh, kh, (((1,), (1,)), ((), ())),
                                preferred_element_type=jnp.float32)
        s = s + bias
        m = jnp.max(s, axis=-1, keepdims=True)
        p = jnp.exp(s - m)
        denom = jnp.sum(p, axis=-1, keepdims=True)
        p = p * pl.reciprocal(denom, approx=True)
        oh = jnp.dot(p.astype(jnp.bfloat16), vh,
                     preferred_element_type=jnp.float32)
        out = out + jnp.dot(oh.astype(jnp.bfloat16),
                            wo_ref[lo:lo + d_head, :],
                            preferred_element_type=jnp.float32)
    return out


def _self_attn_block_kernel(x_ref, g_ref, b_ref, wq_ref, wk_ref, wv_ref,
                            wo_ref, o_ref, *, n_heads, d_head, scale):
    x = x_ref[0].astype(jnp.float32)                     # (n, dim) residual
    n, dim = x.shape
    xn = _ln_f32(x, g_ref[...], b_ref[...])
    xb = xn.astype(jnp.bfloat16)
    q = jnp.dot(xb, wq_ref[...], preferred_element_type=jnp.float32) * scale
    k = jnp.dot(xb, wk_ref[...], preferred_element_type=jnp.float32)
    v = jnp.dot(xb, wv_ref[...], preferred_element_type=jnp.float32)
    # causal mask generated in-kernel (no HBM bias tensor)
    row = jax.lax.broadcasted_iota(jnp.int32, (n, n), 0)
    col = jax.lax.broadcasted_iota(jnp.int32, (n, n), 1)
    bias = jnp.where(row >= col, 0.0, NEG_INF)
    out = _mha(q, k, v, bias, wo_ref, n_heads, d_head, dim)
    o_ref[0] = (x + out).astype(o_ref.dtype)


def _cross_attn_block_kernel(x_ref, ctx_ref, mask_ref, g_ref, b_ref,
                             wq_ref, wk_ref, wv_ref, wo_ref, o_ref,
                             *, n_heads, d_head, scale):
    x = x_ref[0].astype(jnp.float32)                     # (n, dim) residual
    dim = x.shape[1]
    xn = _ln_f32(x, g_ref[...], b_ref[...])
    ctx = ctx_ref[0].astype(jnp.bfloat16)                # (nc, dim)
    q = jnp.dot(xn.astype(jnp.bfloat16), wq_ref[...],
                preferred_element_type=jnp.float32) * scale
    k = jnp.dot(ctx, wk_ref[...], preferred_element_type=jnp.float32)
    v = jnp.dot(ctx, wv_ref[...], preferred_element_type=jnp.float32)
    # tiny per-batch padding mask (1, nc) -> additive bias, built in-kernel
    bias = jnp.where(mask_ref[0] > 0.5, 0.0, NEG_INF)
    out = _mha(q, k, v, bias, wo_ref, n_heads, d_head, dim)
    o_ref[0] = (x + out).astype(o_ref.dtype)


def self_attn_block(x, p, n_heads, d_head):
    b, n, dim = x.shape
    inner = p["wq"].shape[1]
    kernel = partial(_self_attn_block_kernel, n_heads=n_heads, d_head=d_head,
                     scale=d_head ** -0.5)
    # TODO(synk): for long sequences convert to a flash-style (bh, n//tq, n//tk)
    # grid with online-softmax scratch; at n=16 a single KV block is optimal.
    return pl.pallas_call(
        kernel,
        out_shape=jax.ShapeDtypeStruct((b, n, dim), x.dtype),
        grid=(b,),
        in_specs=[
            pl.BlockSpec((1, n, dim), lambda i: (i, 0, 0)),
            pl.BlockSpec((1, dim), lambda i: (0, 0)),
            pl.BlockSpec((1, dim), lambda i: (0, 0)),
            pl.BlockSpec((dim, inner), lambda i: (0, 0)),
            pl.BlockSpec((dim, inner), lambda i: (0, 0)),
            pl.BlockSpec((dim, inner), lambda i: (0, 0)),
            pl.BlockSpec((inner, dim), lambda i: (0, 0)),
        ],
        out_specs=pl.BlockSpec((1, n, dim), lambda i: (i, 0, 0)),
        compiler_params=pltpu.CompilerParams(
            dimension_semantics=("parallel",)),
    )(x, p["ln_g"].reshape(1, dim), p["ln_b"].reshape(1, dim),
      p["wq"], p["wk"], p["wv"], p["wo"])


def cross_attn_block(x, ctx, ctx_mask, p, n_heads, d_head):
    b, n, dim = x.shape
    nc = ctx.shape[1]
    inner = p["wq"].shape[1]
    kernel = partial(_cross_attn_block_kernel, n_heads=n_heads, d_head=d_head,
                     scale=d_head ** -0.5)
    return pl.pallas_call(
        kernel,
        out_shape=jax.ShapeDtypeStruct((b, n, dim), x.dtype),
        grid=(b,),
        in_specs=[
            pl.BlockSpec((1, n, dim), lambda i: (i, 0, 0)),
            pl.BlockSpec((1, nc, dim), lambda i: (i, 0, 0)),
            pl.BlockSpec((1, 1, nc), lambda i: (i, 0, 0)),
            pl.BlockSpec((1, dim), lambda i: (0, 0)),
            pl.BlockSpec((1, dim), lambda i: (0, 0)),
            pl.BlockSpec((dim, inner), lambda i: (0, 0)),
            pl.BlockSpec((dim, inner), lambda i: (0, 0)),
            pl.BlockSpec((dim, inner), lambda i: (0, 0)),
            pl.BlockSpec((inner, dim), lambda i: (0, 0)),
        ],
        out_specs=pl.BlockSpec((1, n, dim), lambda i: (i, 0, 0)),
        compiler_params=pltpu.CompilerParams(
            dimension_semantics=("parallel",)),
    )(x, ctx, ctx_mask, p["ln_g"].reshape(1, dim), p["ln_b"].reshape(1, dim),
      p["wq"], p["wk"], p["wv"], p["wo"])


# --------------------- fused LN + FFN + residual (row tiled) ----------------

def _ffn_block_kernel(x_ref, g_ref, b_ref, w1_ref, b1_ref, w2_ref, b2_ref,
                      o_ref):
    x = x_ref[...].astype(jnp.float32)
    xn = _ln_f32(x, g_ref[...], b_ref[...])
    h = jnp.dot(xn.astype(jnp.bfloat16), w1_ref[...],
                preferred_element_type=jnp.float32) + b1_ref[...]
    h = jax.nn.gelu(h)
    out = jnp.dot(h.astype(jnp.bfloat16), w2_ref[...],
                  preferred_element_type=jnp.float32) + b2_ref[...]
    o_ref[...] = (x + out).astype(o_ref.dtype)


def ffn_block(x, p):
    b, n, dim = x.shape
    r = b * n
    ff = p["w1"].shape[1]
    tm = _row_tile(r)
    # TODO(synk): for large dim, add K/N grid axes with a VMEM f32 accumulator;
    # here dim << 128 so full weight blocks are the only legal tiling.
    out = pl.pallas_call(
        _ffn_block_kernel,
        out_shape=jax.ShapeDtypeStruct((r, dim), x.dtype),
        grid=(r // tm,),
        in_specs=[
            pl.BlockSpec((tm, dim), lambda i: (i, 0)),
            pl.BlockSpec((1, dim), lambda i: (0, 0)),
            pl.BlockSpec((1, dim), lambda i: (0, 0)),
            pl.BlockSpec((dim, ff), lambda i: (0, 0)),
            pl.BlockSpec((1, ff), lambda i: (0, 0)),
            pl.BlockSpec((ff, dim), lambda i: (0, 0)),
            pl.BlockSpec((1, dim), lambda i: (0, 0)),
        ],
        out_specs=pl.BlockSpec((tm, dim), lambda i: (i, 0)),
        compiler_params=pltpu.CompilerParams(
            dimension_semantics=("parallel",)),
    )(x.reshape(r, dim), p["ln_g"].reshape(1, dim), p["ln_b"].reshape(1, dim),
      p["w1"], p["b1"].reshape(1, ff), p["w2"], p["b2"].reshape(1, dim))
    return out.reshape(b, n, dim)


# ------------- fused final LN + logits + cross-entropy (no HBM logits) ------

def _ln_logits_xent_kernel(x_ref, g_ref, b_ref, w_ref, bias_ref, labels_ref,
                           o_ref, acc_ref, *, n_rows):
    i = pl.program_id(0)

    @pl.when(i == 0)
    def _():
        acc_ref[...] = jnp.zeros_like(acc_ref)

    x = x_ref[...].astype(jnp.float32)
    xn = _ln_f32(x, g_ref[...], b_ref[...])
    logits = jnp.dot(xn.astype(jnp.bfloat16), w_ref[...],
                     preferred_element_type=jnp.float32) + bias_ref[...]
    r, c = logits.shape
    col = jax.lax.broadcasted_iota(jnp.int32, (r, c), 1)
    onehot = col == labels_ref[...]
    label_logit = jnp.sum(jnp.where(onehot, logits, 0.0), axis=-1,
                          keepdims=True)
    m = jnp.max(logits, axis=-1, keepdims=True)
    lse = m + jnp.log(jnp.sum(jnp.exp(logits - m), axis=-1, keepdims=True))
    acc_ref[...] += jnp.sum(lse - label_logit, keepdims=True)

    @pl.when(i == pl.num_programs(0) - 1)
    def _():
        o_ref[...] = acc_ref[...] / float(n_rows)


def fused_loss(x2d, g, b, w_bf16, bias, labels2d):
    r, dim = x2d.shape
    c = w_bf16.shape[1]
    tm = _row_tile(r)
    out = pl.pallas_call(
        partial(_ln_logits_xent_kernel, n_rows=r),
        out_shape=jax.ShapeDtypeStruct((1, 1), jnp.float32),
        grid=(r // tm,),
        in_specs=[
            pl.BlockSpec((tm, dim), lambda i: (i, 0)),
            pl.BlockSpec((1, dim), lambda i: (0, 0)),
            pl.BlockSpec((1, dim), lambda i: (0, 0)),
            pl.BlockSpec((dim, c), lambda i: (0, 0)),
            pl.BlockSpec((1, c), lambda i: (0, 0)),
            pl.BlockSpec((tm, 1), lambda i: (i, 0)),
        ],
        out_specs=pl.BlockSpec((1, 1), lambda i: (0, 0)),
        scratch_shapes=[pltpu.VMEM((1, 1), jnp.float32)],
        compiler_params=pltpu.CompilerParams(
            dimension_semantics=("arbitrary",)),
    )(x2d, g.reshape(1, dim), b.reshape(1, dim), w_bf16, bias.reshape(1, c),
      labels2d)
    return out[0, 0]


# ------------------------------ model glue ---------------------------------

def positional_encoding(n, dim):
    pos = jnp.arange(n, dtype=jnp.float32)[:, None]
    div = jnp.exp(jnp.arange(0, dim, 2, dtype=jnp.float32)
                  * (-math.log(10000.0) / dim))
    pe = jnp.zeros((n, dim), jnp.float32)
    pe = pe.at[:, 0::2].set(jnp.sin(pos * div))
    pe = pe.at[:, 1::2].set(jnp.cos(pos * div))
    return pe


def parti_forward(params, t5_embeds, context_mask, img_token_indices, cfg):
    b, lt, t5_dim = t5_embeds.shape
    dim, h, dh = cfg["dim"], cfg["n_heads"], cfg["d_head"]

    # TextEncoder tail: t5 encoding is external; fused projection + context LN.
    text = text_proj_ln(t5_embeds.reshape(b * lt, t5_dim),
                        params["text_proj_w"], params["ctx_ln_g"],
                        params["ctx_ln_b"]).reshape(b, lt, dim)
    ctx_mask_f = context_mask.astype(jnp.float32).reshape(b, 1, lt)

    # image token stream
    labels = img_token_indices                       # [b, N]
    inp_idx = img_token_indices[:, :-1]              # [b, N-1]
    tok = jnp.take(params["token_emb"], inp_idx, axis=0)      # [b, N-1, dim]
    tok = tok + positional_encoding(inp_idx.shape[1], dim)[None]
    start = jnp.broadcast_to(params["start_token"][None, None, :], (b, 1, dim))
    x = jnp.concatenate([start, tok], axis=1)        # [b, N, dim]
    n = x.shape[1]

    x = layernorm(x.reshape(b * n, dim),
                  params["init_ln_g"], params["init_ln_b"]).reshape(b, n, dim)

    # TODO(synk): exact internals of the reference `Decoder` are not given;
    # this is a standard pre-norm decoder (self-attn, cross-attn, FFN) per layer.
    for layer in params["layers"]:
        x = self_attn_block(x, layer["self_attn"], h, dh)
        x = cross_attn_block(x, text, ctx_mask_f, layer["cross_attn"], h, dh)
        x = ffn_block(x, layer["ff"])

    # final LN + logits + cross-entropy fused; logits never written to HBM.
    loss = fused_loss(x.reshape(b * n, dim), params["final_ln_g"],
                      params["final_ln_b"], params["logits_w"],
                      params["logits_b"],
                      labels.reshape(b * n, 1).astype(jnp.int32))
    return loss


def init_params(key, cfg):
    dim = cfg["dim"]
    t5_dim = cfg["t5_dim"]
    cs = cfg["codebook_size"]
    inner = cfg["n_heads"] * cfg["d_head"]
    ff_dim = 4 * dim

    keys = iter(jax.random.split(key, 128))

    def nrm(shape, scale=0.02, dtype=jnp.float32):
        w = scale * jax.random.normal(next(keys), shape, jnp.float32)
        return w.astype(dtype)

    bf = jnp.bfloat16  # matmul weights stored in bf16; LN / biases stay f32

    def attn_params():
        return {
            "ln_g": jnp.ones((dim,), jnp.float32),
            "ln_b": jnp.zeros((dim,), jnp.float32),
            "wq": nrm((dim, inner), dtype=bf),
            "wk": nrm((dim, inner), dtype=bf),
            "wv": nrm((dim, inner), dtype=bf),
            "wo": nrm((inner, dim), dtype=bf),
        }

    def ff_params():
        return {
            "ln_g": jnp.ones((dim,), jnp.float32),
            "ln_b": jnp.zeros((dim,), jnp.float32),
            "w1": nrm((dim, ff_dim), dtype=bf),
            "b1": jnp.zeros((ff_dim,), jnp.float32),
            "w2": nrm((ff_dim, dim), dtype=bf),
            "b2": jnp.zeros((dim,), jnp.float32),
        }

    return {
        "text_proj_w": nrm((t5_dim, dim), dtype=bf),
        "ctx_ln_g": jnp.ones((dim,), jnp.float32),
        "ctx_ln_b": jnp.zeros((dim,), jnp.float32),
        "start_token": nrm((dim,), 1.0),
        "token_emb": nrm((cs, dim), 1.0),
        "init_ln_g": jnp.ones((dim,), jnp.float32),
        "init_ln_b": jnp.zeros((dim,), jnp.float32),
        "final_ln_g": jnp.ones((dim,), jnp.float32),
        "final_ln_b": jnp.zeros((dim,), jnp.float32),
        "logits_w": nrm((dim, cs), dtype=bf),
        "logits_b": jnp.zeros((cs,), jnp.float32),
        "layers": [
            {"self_attn": attn_params(),
             "cross_attn": attn_params(),
             "ff": ff_params()}
            for _ in range(cfg["depth"])
        ],
    }


if __name__ == "__main__":
    cfg = dict(dim=32, n_heads=2, d_head=16, depth=2,
               t5_dim=64, max_length=8, codebook_size=256, num_patches=16)
    b = 2

    root = jax.random.PRNGKey(0)
    k_param, k_text, k_idx = jax.random.split(root, 3)

    params = init_params(k_param, cfg)

    # Synthetic stand-ins for T5 encoder output and VQ image-token indices.
    t5_embeds = jax.random.normal(
        k_text, (b, cfg["max_length"], cfg["t5_dim"]), jnp.float32)
    lengths = jnp.array([cfg["max_length"], 5])
    context_mask = jnp.arange(cfg["max_length"])[None, :] < lengths[:, None]
    img_token_indices = jax.random.randint(
        k_idx, (b, cfg["num_patches"]), 0, cfg["codebook_size"], dtype=jnp.int32)

    loss_fn = jax.jit(
        lambda p, t, m, idx: parti_forward(p, t, m, idx, cfg))
    loss = loss_fn(params, t5_embeds, context_mask, img_token_indices)
    loss = jax.block_until_ready(loss)

    if not bool(jnp.isfinite(loss)):
        raise RuntimeError("non-finite loss")
    print("KERNEL_OK")
</pallas_src>

<mosaic_0001>
module attributes {stable_mosaic.version = 11 : i64} {
  func.func @_ln_kernel(%arg0: i32, %arg1: memref<32x32xf32, #tpu.memory_space<vmem>>, %arg2: memref<1x32xf32, #tpu.memory_space<vmem>>, %arg3: memref<1x32xf32, #tpu.memory_space<vmem>>, %arg4: memref<32x32xf32, #tpu.memory_space<vmem>>) attributes {dimension_semantics = [#tpu.dimension_semantics<parallel>], iteration_bounds = array<i64: 1>, scalar_prefetch = 0 : i64, scratch_operands = 0 : i64, tpu.core_type = #tpu.core_type<tc>, window_params = [{transform_indices = @transform_0, window_bounds = array<i64: 32, 32>}, {pipeline_mode = #tpu.pipeline_mode<synchronous>, transform_indices = @transform_1, window_bounds = array<i64: 1, 32>}, {pipeline_mode = #tpu.pipeline_mode<synchronous>, transform_indices = @transform_2, window_bounds = array<i64: 1, 32>}, {transform_indices = @transform_3, window_bounds = array<i64: 32, 32>}]} {
    %c0 = arith.constant 0 : index
    %c0_0 = arith.constant 0 : index
    %0 = vector.load %arg1[%c0, %c0_0] : memref<32x32xf32, #tpu.memory_space<vmem>>, vector<32x32xf32>
    %c0_1 = arith.constant 0 : index
    %c0_2 = arith.constant 0 : index
    %1 = vector.load %arg2[%c0_1, %c0_2] : memref<1x32xf32, #tpu.memory_space<vmem>>, vector<1x32xf32>
    %c0_3 = arith.constant 0 : index
    %c0_4 = arith.constant 0 : index
    %2 = vector.load %arg3[%c0_3, %c0_4] : memref<1x32xf32, #tpu.memory_space<vmem>>, vector<1x32xf32>
    %cst = arith.constant dense<0.000000e+00> : vector<32xf32>
    %3 = vector.multi_reduction <add>, %0, %cst [1] : vector<32x32xf32> to vector<32xf32>
    %4 = vector.shape_cast %3 : vector<32xf32> to vector<32x1xf32>
    %cst_5 = arith.constant 3.200000e+01 : f32
    %5 = vector.broadcast %cst_5 : f32 to vector<32x1xf32>
    %6 = arith.divf %4, %5 : vector<32x1xf32>
    %7 = vector.broadcast %6 : vector<32x1xf32> to vector<32x32xf32>
    %8 = arith.subf %0, %7 : vector<32x32xf32>
    %9 = arith.mulf %8, %8 : vector<32x32xf32>
    %cst_6 = arith.constant dense<0.000000e+00> : vector<32xf32>
    %10 = vector.multi_reduction <add>, %9, %cst_6 [1] : vector<32x32xf32> to vector<32xf32>
    %11 = vector.shape_cast %10 : vector<32xf32> to vector<32x1xf32>
    %cst_7 = arith.constant 3.200000e+01 : f32
    %12 = vector.broadcast %cst_7 : f32 to vector<32x1xf32>
    %13 = arith.divf %11, %12 : vector<32x1xf32>
    %14 = vector.broadcast %6 : vector<32x1xf32> to vector<32x32xf32>
    %15 = arith.subf %0, %14 : vector<32x32xf32>
    %cst_8 = arith.constant 9.99999974E-6 : f32
    %16 = vector.broadcast %cst_8 : f32 to vector<32x1xf32>
    %17 = arith.addf %13, %16 : vector<32x1xf32>
    %18 = math.rsqrt %17 : vector<32x1xf32>
    %19 = vector.broadcast %18 : vector<32x1xf32> to vector<32x32xf32>
    %20 = arith.mulf %15, %19 : vector<32x32xf32>
    %21 = vector.broadcast %1 : vector<1x32xf32> to vector<32x32xf32>
    %22 = arith.mulf %20, %21 : vector<32x32xf32>
    %23 = vector.broadcast %2 : vector<1x32xf32> to vector<32x32xf32>
    %24 = arith.addf %22, %23 : vector<32x32xf32>
    %c0_9 = arith.constant 0 : index
    %c0_10 = arith.constant 0 : index
    %25 = vector.load %arg4[%c0_9, %c0_10] : memref<32x32xf32, #tpu.memory_space<vmem>>, vector<32x32xf32>
    tpu.vector_store %arg4[%c0_9, %c0_10], %24 {strides = array<i32>} : memref<32x32xf32, #tpu.memory_space<vmem>>, vector<32x32xf32>,
    return
  }
  func.func @transform_0(%arg0: i32) -> (i32, i32) {
    %c0_i32 = arith.constant 0 : i32
    %c0_i32_0 = arith.constant 0 : i32
    return %arg0, %c0_i32 : i32, i32
  }
  func.func @transform_1(%arg0: i32) -> (i32, i32) {
    %c0_i32 = arith.constant 0 : i32
    %c0_i32_0 = arith.constant 0 : i32
    %c0_i32_1 = arith.constant 0 : i32
    return %c0_i32, %c0_i32_0 : i32, i32
  }
  func.func @transform_2(%arg0: i32) -> (i32, i32) {
    %c0_i32 = arith.constant 0 : i32
    %c0_i32_0 = arith.constant 0 : i32
    %c0_i32_1 = arith.constant 0 : i32
    return %c0_i32, %c0_i32_0 : i32, i32
  }
  func.func @transform_3(%arg0: i32) -> (i32, i32) {
    %c0_i32 = arith.constant 0 : i32
    %c0_i32_0 = arith.constant 0 : i32
    return %arg0, %c0_i32 : i32, i32
  }
}

module attributes {stable_mosaic.version = 11 : i64} {
  func.func @_self_attn_block_kernel(%arg0: i32, %arg1: memref<1x16x32xf32, #tpu.memory_space<vmem>>, %arg2: memref<1x32xf32, #tpu.memory_space<vmem>>, %arg3: memref<1x32xf32, #tpu.memory_space<vmem>>, %arg4: memref<32x32xbf16, #tpu.memory_space<vmem>>, %arg5: memref<32x32xbf16, #tpu.memory_space<vmem>>, %arg6: memref<32x32xbf16, #tpu.memory_space<vmem>>, %arg7: memref<32x32xbf16, #tpu.memory_space<vmem>>, %arg8: memref<1x16x32xf32, #tpu.memory_space<vmem>>) attributes {dimension_semantics = [#tpu.dimension_semantics<parallel>], iteration_bounds = array<i64: 2>, scalar_prefetch = 0 : i64, scratch_operands = 0 : i64, tpu.core_type = #tpu.core_type<tc>, window_params = [{transform_indices = @transform_0, window_bounds = array<i64: 1, 16, 32>}, {pipeline_mode = #tpu.pipeline_mode<synchronous>, transform_indices = @transform_1, window_bounds = array<i64: 1, 32>}, {pipeline_mode = #tpu.pipeline_mode<synchronous>, transform_indices = @transform_2, window_bounds = array<i64: 1, 32>}, {pipeline_mode = #tpu.pipeline_mode<synchronous>, transform_indices = @transform_3, window_bounds = array<i64: 32, 32>}, {pipeline_mode = #tpu.pipeline_mode<synchronous>, transform_indices = @transform_4, window_bounds = array<i64: 32, 32>}, {pipeline_mode = #tpu.pipeline_mode<synchronous>, transform_indices = @transform_5, window_bounds = array<i64: 32, 32>}, {pipeline_mode = #tpu.pipeline_mode<synchronous>, transform_indices = @transform_6, window_bounds = array<i64: 32, 32>}, {transform_indices = @transform_7, window_bounds = array<i64: 1, 16, 32>}]} {
    %c0 = arith.constant 0 : index
    %c0_0 = arith.constant 0 : index
    %c0_1 = arith.constant 0 : index
    %0 = vector.load %arg1[%c0, %c0_0, %c0_1] : memref<1x16x32xf32, #tpu.memory_space<vmem>>, vector<1x16x32xf32>
    %1 = vector.shape_cast %0 : vector<1x16x32xf32> to vector<16x32xf32>
    %c0_2 = arith.constant 0 : index
    %c0_3 = arith.constant 0 : index
    %2 = vector.load %arg2[%c0_2, %c0_3] : memref<1x32xf32, #tpu.memory_space<vmem>>, vector<1x32xf32>
    %c0_4 = arith.constant 0 : index
    %c0_5 = arith.constant 0 : index
    %3 = vector.load %arg3[%c0_4, %c0_5] : memref<1x32xf32, #tpu.memory_space<vmem>>, vector<1x32xf32>
    %cst = arith.constant dense<0.000000e+00> : vector<16xf32>
    %4 = vector.multi_reduction <add>, %1, %cst [1] : vector<16x32xf32> to vector<16xf32>
    %5 = vector.shape_cast %4 : vector<16xf32> to vector<16x1xf32>
    %cst_6 = arith.constant 3.200000e+01 : f32
    %6 = vector.broadcast %cst_6 : f32 to vector<16x1xf32>
    %7 = arith.divf %5, %6 : vector<16x1xf32>
    %8 = vector.broadcast %7 : vector<16x1xf32> to vector<16x32xf32>
    %9 = arith.subf %1, %8 : vector<16x32xf32>
    %10 = arith.mulf %9, %9 : vector<16x32xf32>
    %cst_7 = arith.constant dense<0.000000e+00> : vector<16xf32>
    %11 = vector.multi_reduction <add>, %10, %cst_7 [1] : vector<16x32xf32> to vector<16xf32>
    %12 = vector.shape_cast %11 : vector<16xf32> to vector<16x1xf32>
    %cst_8 = arith.constant 3.200000e+01 : f32
    %13 = vector.broadcast %cst_8 : f32 to vector<16x1xf32>
    %14 = arith.divf %12, %13 : vector<16x1xf32>
    %15 = vector.broadcast %7 : vector<16x1xf32> to vector<16x32xf32>
    %16 = arith.subf %1, %15 : vector<16x32xf32>
    %cst_9 = arith.constant 9.99999974E-6 : f32
    %17 = vector.broadcast %cst_9 : f32 to vector<16x1xf32>
    %18 = arith.addf %14, %17 : vector<16x1xf32>
    %19 = math.rsqrt %18 : vector<16x1xf32>
    %20 = vector.broadcast %19 : vector<16x1xf32> to vector<16x32xf32>
    %21 = arith.mulf %16, %20 : vector<16x32xf32>
    %22 = vector.broadcast %2 : vector<1x32xf32> to vector<16x32xf32>
    %23 = arith.mulf %21, %22 : vector<16x32xf32>
    %24 = vector.broadcast %3 : vector<1x32xf32> to vector<16x32xf32>
    %25 = arith.addf %23, %24 : vector<16x32xf32>
    %26 = arith.truncf %25 : vector<16x32xf32> to vector<16x32xbf16>
    %c0_10 = arith.constant 0 : index
    %c0_11 = arith.constant 0 : index
    %27 = vector.load %arg4[%c0_10, %c0_11] : memref<32x32xbf16, #tpu.memory_space<vmem>>, vector<32x32xbf16>
    %cst_12 = arith.constant dense<0.000000e+00> : vector<16x32xf32>
    %28 = tpu.matmul %26, %27, %cst_12 {dimension_numbers = #tpu.dot_dimension_numbers<[1], [0], [0], [1], [0, 0, 1, 1], [], []>} : vector<16x32xbf16>, vector<32x32xbf16>, vector<16x32xf32> -> vector<16x32xf32>
    %cst_13 = arith.constant 2.500000e-01 : f32
    %29 = vector.broadcast %cst_13 : f32 to vector<16x32xf32>
    %30 = arith.mulf %28, %29 : vector<16x32xf32>
    %c0_14 = arith.constant 0 : index
    %c0_15 = arith.constant 0 : index
    %31 = vector.load %arg5[%c0_14, %c0_15] : memref<32x32xbf16, #tpu.memory_space<vmem>>, vector<32x32xbf16>
    %cst_16 = arith.constant dense<0.000000e+00> : vector<16x32xf32>
    %32 = tpu.matmul %26, %31, %cst_16 {dimension_numbers = #tpu.dot_dimension_numbers<[1], [0], [0], [1], [0, 0, 1, 1], [], []>} : vector<16x32xbf16>, vector<32x32xbf16>, vector<16x32xf32> -> vector<16x32xf32>
    %c0_17 = arith.constant 0 : index
    %c0_18 = arith.constant 0 : index
    %33 = vector.load %arg6[%c0_17, %c0_18] : memref<32x32xbf16, #tpu.memory_space<vmem>>, vector<32x32xbf16>
    %cst_19 = arith.constant dense<0.000000e+00> : vector<16x32xf32>
    %34 = tpu.matmul %26, %33, %cst_19 {dimension_numbers = #tpu.dot_dimension_numbers<[1], [0], [0], [1], [0, 0, 1, 1], [], []>} : vector<16x32xbf16>, vector<32x32xbf16>, vector<16x32xf32> -> vector<16x32xf32>
    %35 = tpu.iota {dimensions = array<i32: 0>} : vector<16x16xi32>
    %36 = tpu.iota {dimensions = array<i32: 1>} : vector<16x16xi32>
    %37 = arith.cmpi sge, %35, %36 : vector<16x16xi32>
    %cst_20 = arith.constant 0.000000e+00 : f32
    %cst_21 = arith.constant -1.000000e+30 : f32
    %38 = vector.broadcast %cst_20 : f32 to vector<16x16xf32>
    %39 = vector.broadcast %cst_21 : f32 to vector<16x16xf32>
    %40 = arith.select %37, %38, %39 : vector<16x16xi1>, vector<16x16xf32>
    %cst_22 = arith.constant 0.000000e+00 : f32
    %41 = vector.broadcast %cst_22 : f32 to vector<16x32xf32>
    %42 = vector.extract_strided_slice %30 {offsets = [0, 0], sizes = [16, 16], strides = [1, 1]} : vector<16x32xf32> to vector<16x16xf32>
    %43 = arith.truncf %42 : vector<16x16xf32> to vector<16x16xbf16>
    %44 = vector.extract_strided_slice %32 {offsets = [0, 0], sizes = [16, 16], strides = [1, 1]} : vector<16x32xf32> to vector<16x16xf32>
    %45 = arith.truncf %44 : vector<16x16xf32> to vector<16x16xbf16>
    %46 = vector.extract_strided_slice %34 {offsets = [0, 0], sizes = [16, 16], strides = [1, 1]} : vector<16x32xf32> to vector<16x16xf32>
    %47 = arith.truncf %46 : vector<16x16xf32> to vector<16x16xbf16>
    %cst_23 = arith.constant dense<0.000000e+00> : vector<16x16xf32>
    %48 = tpu.matmul %43, %45, %cst_23 {dimension_numbers = #tpu.dot_dimension_numbers<[1], [1], [0], [0], [0, 0, 1, 0], [], []>} : vector<16x16xbf16>, vector<16x16xbf16>, vector<16x16xf32> -> vector<16x16xf32>
    %49 = arith.addf %48, %40 : vector<16x16xf32>
    %cst_24 = arith.constant dense<0xFF800000> : vector<16xf32>
    %50 = vector.multi_reduction <maximumf>, %49, %cst_24 [1] : vector<16x16xf32> to vector<16xf32>
    %51 = vector.shape_cast %50 : vector<16xf32> to vector<16x1xf32>
    %52 = vector.broadcast %51 : vector<16x1xf32> to vector<16x16xf32>
    %53 = arith.subf %49, %52 : vector<16x16xf32>
    %54 = math.exp %53 : vector<16x16xf32>
    %cst_25 = arith.constant dense<0.000000e+00> : vector<16xf32>
    %55 = vector.multi_reduction <add>, %54, %cst_25 [1] : vector<16x16xf32> to vector<16xf32>
    %56 = vector.shape_cast %55 : vector<16xf32> to vector<16x1xf32>
    %57 = tpu.reciprocal %56 {approx = true} : vector<16x1xf32> -> vector<16x1xf32>
    %58 = vector.broadcast %57 : vector<16x1xf32> to vector<16x16xf32>
    %59 = arith.mulf %54, %58 : vector<16x16xf32>
    %60 = arith.truncf %59 : vector<16x16xf32> to vector<16x16xbf16>
    %cst_26 = arith.constant dense<0.000000e+00> : vector<16x16xf32>
    %61 = tpu.matmul %60, %47, %cst_26 {dimension_numbers = #tpu.dot_dimension_numbers<[1], [0], [0], [1], [0, 0, 1, 1], [], []>} : vector<16x16xbf16>, vector<16x16xbf16>, vector<16x16xf32> -> vector<16x16xf32>
    %62 = arith.truncf %61 : vector<16x16xf32> to vector<16x16xbf16>
    %c0_27 = arith.constant 0 : index
    %c0_28 = arith.constant 0 : index
    %63 = vector.load %arg7[%c0_27, %c0_28] : memref<32x32xbf16, #tpu.memory_space<vmem>>, vector<16x32xbf16>
    %cst_29 = arith.constant dense<0.000000e+00> : vector<16x32xf32>
    %64 = tpu.matmul %62, %63, %cst_29 {dimension_numbers = #tpu.dot_dimension_numbers<[1], [0], [0], [1], [0, 0, 1, 1], [], []>} : vector<16x16xbf16>, vector<16x32xbf16>, vector<16x32xf32> -> vector<16x32xf32>
    %65 = arith.addf %41, %64 : vector<16x32xf32>
    %66 = vector.extract_strided_slice %30 {offsets = [0, 16], sizes = [16, 16], strides = [1, 1]} : vector<16x32xf32> to vector<16x16xf32>
    %67 = arith.truncf %66 : vector<16x16xf32> to vector<16x16xbf16>
    %68 = vector.extract_strided_slice %32 {offsets = [0, 16], sizes = [16, 16], strides = [1, 1]} : vector<16x32xf32> to vector<16x16xf32>
    %69 = arith.truncf %68 : vector<16x16xf32> to vector<16x16xbf16>
    %70 = vector.extract_strided_slice %34 {offsets = [0, 16], sizes = [16, 16], strides = [1, 1]} : vector<16x32xf32> to vector<16x16xf32>
    %71 = arith.truncf %70 : vector<16x16xf32> to vector<16x16xbf16>
    %cst_30 = arith.constant dense<0.000000e+00> : vector<16x16xf32>
    %72 = tpu.matmul %67, %69, %cst_30 {dimension_numbers = #tpu.dot_dimension_numbers<[1], [1], [0], [0], [0, 0, 1, 0], [], []>} : vector<16x16xbf16>, vector<16x16xbf16>, vector<16x16xf32> -> vector<16x16xf32>
    %73 = arith.addf %72, %40 : vector<16x16xf32>
    %cst_31 = arith.constant dense<0xFF800000> : vector<16xf32>
    %74 = vector.multi_reduction <maximumf>, %73, %cst_31 [1] : vector<16x16xf32> to vector<16xf32>
    %75 = vector.shape_cast %74 : vector<16xf32> to vector<16x1xf32>
    %76 = vector.broadcast %75 : vector<16x1xf32> to vector<16x16xf32>
    %77 = arith.subf %73, %76 : vector<16x16xf32>
    %78 = math.exp %77 : vector<16x16xf32>
    %cst_32 = arith.constant dense<0.000000e+00> : vector<16xf32>
    %79 = vector.multi_reduction <add>, %78, %cst_32 [1] : vector<16x16xf32> to vector<16xf32>
    %80 = vector.shape_cast %79 : vector<16xf32> to vector<16x1xf32>
    %81 = tpu.reciprocal %80 {approx = true} : vector<16x1xf32> -> vector<16x1xf32>
    %82 = vector.broadcast %81 : vector<16x1xf32> to vector<16x16xf32>
    %83 = arith.mulf %78, %82 : vector<16x16xf32>
    %84 = arith.truncf %83 : vector<16x16xf32> to vector<16x16xbf16>
    %cst_33 = arith.constant dense<0.000000e+00> : vector<16x16xf32>
    %85 = tpu.matmul %84, %71, %cst_33 {dimension_numbers = #tpu.dot_dimension_numbers<[1], [0], [0], [1], [0, 0, 1, 1], [], []>} : vector<16x16xbf16>, vector<16x16xbf16>, vector<16x16xf32> -> vector<16x16xf32>
    %86 = arith.truncf %85 : vector<16x16xf32> to vector<16x16xbf16>
    %c16 = arith.constant 16 : index
    %c0_34 = arith.constant 0 : index
    %87 = vector.load %arg7[%c16, %c0_34] : memref<32x32xbf16, #tpu.memory_space<vmem>>, vector<16x32xbf16>
    %cst_35 = arith.constant dense<0.000000e+00> : vector<16x32xf32>
    %88 = tpu.matmul %86, %87, %cst_35 {dimension_numbers = #tpu.dot_dimension_numbers<[1], [0], [0], [1], [0, 0, 1, 1], [], []>} : vector<16x16xbf16>, vector<16x32xbf16>, vector<16x32xf32> -> vector<16x32xf32>
    %89 = arith.addf %65, %88 : vector<16x32xf32>
    %90 = arith.addf %1, %89 : vector<16x32xf32>
    %c0_36 = arith.constant 0 : index
    %c0_37 = arith.constant 0 : index
    %c0_38 = arith.constant 0 : index
    %91 = vector.load %arg8[%c0_36, %c0_37, %c0_38] : memref<1x16x32xf32, #tpu.memory_space<vmem>>, vector<1x16x32xf32>
    %92 = vector.shape_cast %91 : vector<1x16x32xf32> to vector<16x32xf32>
    %93 = vector.shape_cast %90 : vector<16x32xf32> to vector<1x16x32xf32>
    tpu.vector_store %arg8[%c0_36, %c0_37, %c0_38], %93 {strides = array<i32>} : memref<1x16x32xf32, #tpu.memory_space<vmem>>, vector<1x16x32xf32>,
    return
  }
  func.func @transform_0(%arg0: i32) -> (i32, i32, i32) {
    %c0_i32 = arith.constant 0 : i32
    %c0_i32_0 = arith.constant 0 : i32
    %c0_i32_1 = arith.constant 0 : i32
    return %arg0, %c0_i32, %c0_i32_0 : i32, i32, i32
  }
  func.func @transform_1(%arg0: i32) -> (i32, i32) {
    %c0_i32 = arith.constant 0 : i32
    %c0_i32_0 = arith.constant 0 : i32
    %c0_i32_1 = arith.constant 0 : i32
    return %c0_i32, %c0_i32_0 : i32, i32
  }
  func.func @transform_2(%arg0: i32) -> (i32, i32) {
    %c0_i32 = arith.constant 0 : i32
    %c0_i32_0 = arith.constant 0 : i32
    %c0_i32_1 = arith.constant 0 : i32
    return %c0_i32, %c0_i32_0 : i32, i32
  }
  func.func @transform_3(%arg0: i32) -> (i32, i32) {
    %c0_i32 = arith.constant 0 : i32
    %c0_i32_0 = arith.constant 0 : i32
    %c0_i32_1 = arith.constant 0 : i32
    return %c0_i32, %c0_i32_0 : i32, i32
  }
  func.func @transform_4(%arg0: i32) -> (i32, i32) {
    %c0_i32 = arith.constant 0 : i32
    %c0_i32_0 = arith.constant 0 : i32
    %c0_i32_1 = arith.constant 0 : i32
    return %c0_i32, %c0_i32_0 : i32, i32
  }
  func.func @transform_5(%arg0: i32) -> (i32, i32) {
    %c0_i32 = arith.constant 0 : i32
    %c0_i32_0 = arith.constant 0 : i32
    %c0_i32_1 = arith.constant 0 : i32
    return %c0_i32, %c0_i32_0 : i32, i32
  }
  func.func @transform_6(%arg0: i32) -> (i32, i32) {
    %c0_i32 = arith.constant 0 : i32
    %c0_i32_0 = arith.constant 0 : i32
    %c0_i32_1 = arith.constant 0 : i32
    return %c0_i32, %c0_i32_0 : i32, i32
  }
  func.func @transform_7(%arg0: i32) -> (i32, i32, i32) {
    %c0_i32 = arith.constant 0 : i32
    %c0_i32_0 = arith.constant 0 : i32
    %c0_i32_1 = arith.constant 0 : i32
    return %arg0, %c0_i32, %c0_i32_0 : i32, i32, i32
  }
}

module attributes {stable_mosaic.version = 11 : i64} {
  func.func @_text_proj_ln_kernel(%arg0: i32, %arg1: memref<16x64xf32, #tpu.memory_space<vmem>>, %arg2: memref<64x32xbf16, #tpu.memory_space<vmem>>, %arg3: memref<1x32xf32, #tpu.memory_space<vmem>>, %arg4: memref<1x32xf32, #tpu.memory_space<vmem>>, %arg5: memref<16x32xbf16, #tpu.memory_space<vmem>>) attributes {dimension_semantics = [#tpu.dimension_semantics<parallel>], iteration_bounds = array<i64: 1>, scalar_prefetch = 0 : i64, scratch_operands = 0 : i64, tpu.core_type = #tpu.core_type<tc>, window_params = [{transform_indices = @transform_0, window_bounds = array<i64: 16, 64>}, {pipeline_mode = #tpu.pipeline_mode<synchronous>, transform_indices = @transform_1, window_bounds = array<i64: 64, 32>}, {pipeline_mode = #tpu.pipeline_mode<synchronous>, transform_indices = @transform_2, window_bounds = array<i64: 1, 32>}, {pipeline_mode = #tpu.pipeline_mode<synchronous>, transform_indices = @transform_3, window_bounds = array<i64: 1, 32>}, {transform_indices = @transform_4, window_bounds = array<i64: 16, 32>}]} {
    %c0 = arith.constant 0 : index
    %c0_0 = arith.constant 0 : index
    %0 = vector.load %arg1[%c0, %c0_0] : memref<16x64xf32, #tpu.memory_space<vmem>>, vector<16x64xf32>
    %1 = arith.truncf %0 : vector<16x64xf32> to vector<16x64xbf16>
    %c0_1 = arith.constant 0 : index
    %c0_2 = arith.constant 0 : index
    %2 = vector.load %arg2[%c0_1, %c0_2] : memref<64x32xbf16, #tpu.memory_space<vmem>>, vector<64x32xbf16>
    %cst = arith.constant dense<0.000000e+00> : vector<16x32xf32>
    %3 = tpu.matmul %1, %2, %cst {dimension_numbers = #tpu.dot_dimension_numbers<[1], [0], [0], [1], [0, 0, 1, 1], [], []>} : vector<16x64xbf16>, vector<64x32xbf16>, vector<16x32xf32> -> vector<16x32xf32>
    %c0_3 = arith.constant 0 : index
    %c0_4 = arith.constant 0 : index
    %4 = vector.load %arg3[%c0_3, %c0_4] : memref<1x32xf32, #tpu.memory_space<vmem>>, vector<1x32xf32>
    %c0_5 = arith.constant 0 : index
    %c0_6 = arith.constant 0 : index
    %5 = vector.load %arg4[%c0_5, %c0_6] : memref<1x32xf32, #tpu.memory_space<vmem>>, vector<1x32xf32>
    %cst_7 = arith.constant dense<0.000000e+00> : vector<16xf32>
    %6 = vector.multi_reduction <add>, %3, %cst_7 [1] : vector<16x32xf32> to vector<16xf32>
    %7 = vector.shape_cast %6 : vector<16xf32> to vector<16x1xf32>
    %cst_8 = arith.constant 3.200000e+01 : f32
    %8 = vector.broadcast %cst_8 : f32 to vector<16x1xf32>
    %9 = arith.divf %7, %8 : vector<16x1xf32>
    %10 = vector.broadcast %9 : vector<16x1xf32> to vector<16x32xf32>
    %11 = arith.subf %3, %10 : vector<16x32xf32>
    %12 = arith.mulf %11, %11 : vector<16x32xf32>
    %cst_9 = arith.constant dense<0.000000e+00> : vector<16xf32>
    %13 = vector.multi_reduction <add>, %12, %cst_9 [1] : vector<16x32xf32> to vector<16xf32>
    %14 = vector.shape_cast %13 : vector<16xf32> to vector<16x1xf32>
    %cst_10 = arith.constant 3.200000e+01 : f32
    %15 = vector.broadcast %cst_10 : f32 to vector<16x1xf32>
    %16 = arith.divf %14, %15 : vector<16x1xf32>
    %17 = vector.broadcast %9 : vector<16x1xf32> to vector<16x32xf32>
    %18 = arith.subf %3, %17 : vector<16x32xf32>
    %cst_11 = arith.constant 9.99999974E-6 : f32
    %19 = vector.broadcast %cst_11 : f32 to vector<16x1xf32>
    %20 = arith.addf %16, %19 : vector<16x1xf32>
    %21 = math.rsqrt %20 : vector<16x1xf32>
    %22 = vector.broadcast %21 : vector<16x1xf32> to vector<16x32xf32>
    %23 = arith.mulf %18, %22 : vector<16x32xf32>
    %24 = vector.broadcast %4 : vector<1x32xf32> to vector<16x32xf32>
    %25 = arith.mulf %23, %24 : vector<16x32xf32>
    %26 = vector.broadcast %5 : vector<1x32xf32> to vector<16x32xf32>
    %27 = arith.addf %25, %26 : vector<16x32xf32>
    %28 = arith.truncf %27 : vector<16x32xf32> to vector<16x32xbf16>
    %c0_12 = arith.constant 0 : index
    %c0_13 = arith.constant 0 : index
    %29 = vector.load %arg5[%c0_12, %c0_13] : memref<16x32xbf16, #tpu.memory_space<vmem>>, vector<16x32xbf16>
    tpu.vector_store %arg5[%c0_12, %c0_13], %28 {strides = array<i32>} : memref<16x32xbf16, #tpu.memory_space<vmem>>, vector<16x32xbf16>,
    return
  }
  func.func @transform_0(%arg0: i32) -> (i32, i32) {
    %c0_i32 = arith.constant 0 : i32
    %c0_i32_0 = arith.constant 0 : i32
    return %arg0, %c0_i32 : i32, i32
  }
  func.func @transform_1(%arg0: i32) -> (i32, i32) {
    %c0_i32 = arith.constant 0 : i32
    %c0_i32_0 = arith.constant 0 : i32
    %c0_i32_1 = arith.constant 0 : i32
    return %c0_i32, %c0_i32_0 : i32, i32
  }
  func.func @transform_2(%arg0: i32) -> (i32, i32) {
    %c0_i32 = arith.constant 0 : i32
    %c0_i32_0 = arith.constant 0 : i32
    %c0_i32_1 = arith.constant 0 : i32
    return %c0_i32, %c0_i32_0 : i32, i32
  }
  func.func @transform_3(%arg0: i32) -> (i32, i32) {
    %c0_i32 = arith.constant 0 : i32
    %c0_i32_0 = arith.constant 0 : i32
    %c0_i32_1 = arith.constant 0 : i32
    return %c0_i32, %c0_i32_0 : i32, i32
  }
  func.func @transform_4(%arg0: i32) -> (i32, i32) {
    %c0_i32 = arith.constant 0 : i32
    %c0_i32_0 = arith.constant 0 : i32
    return %arg0, %c0_i32 : i32, i32
  }
}

module attributes {stable_mosaic.version = 11 : i64} {
  func.func @_cross_attn_block_kernel(%arg0: i32, %arg1: memref<1x16x32xf32, #tpu.memory_space<vmem>>, %arg2: memref<1x8x32xbf16, #tpu.memory_space<vmem>>, %arg3: memref<1x1x8xf32, #tpu.memory_space<vmem>>, %arg4: memref<1x32xf32, #tpu.memory_space<vmem>>, %arg5: memref<1x32xf32, #tpu.memory_space<vmem>>, %arg6: memref<32x32xbf16, #tpu.memory_space<vmem>>, %arg7: memref<32x32xbf16, #tpu.memory_space<vmem>>, %arg8: memref<32x32xbf16, #tpu.memory_space<vmem>>, %arg9: memref<32x32xbf16, #tpu.memory_space<vmem>>, %arg10: memref<1x16x32xf32, #tpu.memory_space<vmem>>) attributes {dimension_semantics = [#tpu.dimension_semantics<parallel>], iteration_bounds = array<i64: 2>, scalar_prefetch = 0 : i64, scratch_operands = 0 : i64, tpu.core_type = #tpu.core_type<tc>, window_params = [{transform_indices = @transform_0, window_bounds = array<i64: 1, 16, 32>}, {transform_indices = @transform_1, window_bounds = array<i64: 1, 8, 32>}, {transform_indices = @transform_2, window_bounds = array<i64: 1, 1, 8>}, {pipeline_mode = #tpu.pipeline_mode<synchronous>, transform_indices = @transform_3, window_bounds = array<i64: 1, 32>}, {pipeline_mode = #tpu.pipeline_mode<synchronous>, transform_indices = @transform_4, window_bounds = array<i64: 1, 32>}, {pipeline_mode = #tpu.pipeline_mode<synchronous>, transform_indices = @transform_5, window_bounds = array<i64: 32, 32>}, {pipeline_mode = #tpu.pipeline_mode<synchronous>, transform_indices = @transform_6, window_bounds = array<i64: 32, 32>}, {pipeline_mode = #tpu.pipeline_mode<synchronous>, transform_indices = @transform_7, window_bounds = array<i64: 32, 32>}, {pipeline_mode = #tpu.pipeline_mode<synchronous>, transform_indices = @transform_8, window_bounds = array<i64: 32, 32>}, {transform_indices = @transform_9, window_bounds = array<i64: 1, 16, 32>}]} {
    %c0 = arith.constant 0 : index
    %c0_0 = arith.constant 0 : index
    %c0_1 = arith.constant 0 : index
    %0 = vector.load %arg1[%c0, %c0_0, %c0_1] : memref<1x16x32xf32, #tpu.memory_space<vmem>>, vector<1x16x32xf32>
    %1 = vector.shape_cast %0 : vector<1x16x32xf32> to vector<16x32xf32>
    %c0_2 = arith.constant 0 : index
    %c0_3 = arith.constant 0 : index
    %2 = vector.load %arg4[%c0_2, %c0_3] : memref<1x32xf32, #tpu.memory_space<vmem>>, vector<1x32xf32>
    %c0_4 = arith.constant 0 : index
    %c0_5 = arith.constant 0 : index
    %3 = vector.load %arg5[%c0_4, %c0_5] : memref<1x32xf32, #tpu.memory_space<vmem>>, vector<1x32xf32>
    %cst = arith.constant dense<0.000000e+00> : vector<16xf32>
    %4 = vector.multi_reduction <add>, %1, %cst [1] : vector<16x32xf32> to vector<16xf32>
    %5 = vector.shape_cast %4 : vector<16xf32> to vector<16x1xf32>
    %cst_6 = arith.constant 3.200000e+01 : f32
    %6 = vector.broadcast %cst_6 : f32 to vector<16x1xf32>
    %7 = arith.divf %5, %6 : vector<16x1xf32>
    %8 = vector.broadcast %7 : vector<16x1xf32> to vector<16x32xf32>
    %9 = arith.subf %1, %8 : vector<16x32xf32>
    %10 = arith.mulf %9, %9 : vector<16x32xf32>
    %cst_7 = arith.constant dense<0.000000e+00> : vector<16xf32>
    %11 = vector.multi_reduction <add>, %10, %cst_7 [1] : vector<16x32xf32> to vector<16xf32>
    %12 = vector.shape_cast %11 : vector<16xf32> to vector<16x1xf32>
    %cst_8 = arith.constant 3.200000e+01 : f32
    %13 = vector.broadcast %cst_8 : f32 to vector<16x1xf32>
    %14 = arith.divf %12, %13 : vector<16x1xf32>
    %15 = vector.broadcast %7 : vector<16x1xf32> to vector<16x32xf32>
    %16 = arith.subf %1, %15 : vector<16x32xf32>
    %cst_9 = arith.constant 9.99999974E-6 : f32
    %17 = vector.broadcast %cst_9 : f32 to vector<16x1xf32>
    %18 = arith.addf %14, %17 : vector<16x1xf32>
    %19 = math.rsqrt %18 : vector<16x1xf32>
    %20 = vector.broadcast %19 : vector<16x1xf32> to vector<16x32xf32>
    %21 = arith.mulf %16, %20 : vector<16x32xf32>
    %22 = vector.broadcast %2 : vector<1x32xf32> to vector<16x32xf32>
    %23 = arith.mulf %21, %22 : vector<16x32xf32>
    %24 = vector.broadcast %3 : vector<1x32xf32> to vector<16x32xf32>
    %25 = arith.addf %23, %24 : vector<16x32xf32>
    %c0_10 = arith.constant 0 : index
    %c0_11 = arith.constant 0 : index
    %c0_12 = arith.constant 0 : index
    %26 = vector.load %arg2[%c0_10, %c0_11, %c0_12] : memref<1x8x32xbf16, #tpu.memory_space<vmem>>, vector<1x8x32xbf16>
    %27 = vector.shape_cast %26 : vector<1x8x32xbf16> to vector<8x32xbf16>
    %28 = arith.truncf %25 : vector<16x32xf32> to vector<16x32xbf16>
    %c0_13 = arith.constant 0 : index
    %c0_14 = arith.constant 0 : index
    %29 = vector.load %arg6[%c0_13, %c0_14] : memref<32x32xbf16, #tpu.memory_space<vmem>>, vector<32x32xbf16>
    %cst_15 = arith.constant dense<0.000000e+00> : vector<16x32xf32>
    %30 = tpu.matmul %28, %29, %cst_15 {dimension_numbers = #tpu.dot_dimension_numbers<[1], [0], [0], [1], [0, 0, 1, 1], [], []>} : vector<16x32xbf16>, vector<32x32xbf16>, vector<16x32xf32> -> vector<16x32xf32>
    %cst_16 = arith.constant 2.500000e-01 : f32
    %31 = vector.broadcast %cst_16 : f32 to vector<16x32xf32>
    %32 = arith.mulf %30, %31 : vector<16x32xf32>
    %c0_17 = arith.constant 0 : index
    %c0_18 = arith.constant 0 : index
    %33 = vector.load %arg7[%c0_17, %c0_18] : memref<32x32xbf16, #tpu.memory_space<vmem>>, vector<32x32xbf16>
    %cst_19 = arith.constant dense<0.000000e+00> : vector<8x32xf32>
    %34 = tpu.matmul %27, %33, %cst_19 {dimension_numbers = #tpu.dot_dimension_numbers<[1], [0], [0], [1], [0, 0, 1, 1], [], []>} : vector<8x32xbf16>, vector<32x32xbf16>, vector<8x32xf32> -> vector<8x32xf32>
    %c0_20 = arith.constant 0 : index
    %c0_21 = arith.constant 0 : index
    %35 = vector.load %arg8[%c0_20, %c0_21] : memref<32x32xbf16, #tpu.memory_space<vmem>>, vector<32x32xbf16>
    %cst_22 = arith.constant dense<0.000000e+00> : vector<8x32xf32>
    %36 = tpu.matmul %27, %35, %cst_22 {dimension_numbers = #tpu.dot_dimension_numbers<[1], [0], [0], [1], [0, 0, 1, 1], [], []>} : vector<8x32xbf16>, vector<32x32xbf16>, vector<8x32xf32> -> vector<8x32xf32>
    %c0_23 = arith.constant 0 : index
    %c0_24 = arith.constant 0 : index
    %c0_25 = arith.constant 0 : index
    %37 = vector.load %arg3[%c0_23, %c0_24, %c0_25] : memref<1x1x8xf32, #tpu.memory_space<vmem>>, vector<1x1x8xf32>
    %38 = vector.shape_cast %37 : vector<1x1x8xf32> to vector<1x8xf32>
    %cst_26 = arith.constant 5.000000e-01 : f32
    %39 = vector.broadcast %cst_26 : f32 to vector<1x8xf32>
    %40 = arith.cmpf ogt, %38, %39 : vector<1x8xf32>
    %cst_27 = arith.constant 0.000000e+00 : f32
    %cst_28 = arith.constant -1.000000e+30 : f32
    %41 = vector.broadcast %cst_27 : f32 to vector<1x8xf32>
    %42 = vector.broadcast %cst_28 : f32 to vector<1x8xf32>
    %43 = arith.select %40, %41, %42 : vector<1x8xi1>, vector<1x8xf32>
    %cst_29 = arith.constant 0.000000e+00 : f32
    %44 = vector.broadcast %cst_29 : f32 to vector<16x32xf32>
    %45 = vector.extract_strided_slice %32 {offsets = [0, 0], sizes = [16, 16], strides = [1, 1]} : vector<16x32xf32> to vector<16x16xf32>
    %46 = arith.truncf %45 : vector<16x16xf32> to vector<16x16xbf16>
    %47 = vector.extract_strided_slice %34 {offsets = [0, 0], sizes = [8, 16], strides = [1, 1]} : vector<8x32xf32> to vector<8x16xf32>
    %48 = arith.truncf %47 : vector<8x16xf32> to vector<8x16xbf16>
    %49 = vector.extract_strided_slice %36 {offsets = [0, 0], sizes = [8, 16], strides = [1, 1]} : vector<8x32xf32> to vector<8x16xf32>
    %50 = arith.truncf %49 : vector<8x16xf32> to vector<8x16xbf16>
    %cst_30 = arith.constant dense<0.000000e+00> : vector<16x8xf32>
    %51 = tpu.matmul %46, %48, %cst_30 {dimension_numbers = #tpu.dot_dimension_numbers<[1], [1], [0], [0], [0, 0, 1, 0], [], []>} : vector<16x16xbf16>, vector<8x16xbf16>, vector<16x8xf32> -> vector<16x8xf32>
    %52 = vector.broadcast %43 : vector<1x8xf32> to vector<16x8xf32>
    %53 = arith.addf %51, %52 : vector<16x8xf32>
    %cst_31 = arith.constant dense<0xFF800000> : vector<16xf32>
    %54 = vector.multi_reduction <maximumf>, %53, %cst_31 [1] : vector<16x8xf32> to vector<16xf32>
    %55 = vector.shape_cast %54 : vector<16xf32> to vector<16x1xf32>
    %56 = vector.broadcast %55 : vector<16x1xf32> to vector<16x8xf32>
    %57 = arith.subf %53, %56 : vector<16x8xf32>
    %58 = math.exp %57 : vector<16x8xf32>
    %cst_32 = arith.constant dense<0.000000e+00> : vector<16xf32>
    %59 = vector.multi_reduction <add>, %58, %cst_32 [1] : vector<16x8xf32> to vector<16xf32>
    %60 = vector.shape_cast %59 : vector<16xf32> to vector<16x1xf32>
    %61 = tpu.reciprocal %60 {approx = true} : vector<16x1xf32> -> vector<16x1xf32>
    %62 = vector.broadcast %61 : vector<16x1xf32> to vector<16x8xf32>
    %63 = arith.mulf %58, %62 : vector<16x8xf32>
    %64 = arith.truncf %63 : vector<16x8xf32> to vector<16x8xbf16>
    %cst_33 = arith.constant dense<0.000000e+00> : vector<16x16xf32>
    %65 = tpu.matmul %64, %50, %cst_33 {dimension_numbers = #tpu.dot_dimension_numbers<[1], [0], [0], [1], [0, 0, 1, 1], [], []>} : vector<16x8xbf16>, vector<8x16xbf16>, vector<16x16xf32> -> vector<16x16xf32>
    %66 = arith.truncf %65 : vector<16x16xf32> to vector<16x16xbf16>
    %c0_34 = arith.constant 0 : index
    %c0_35 = arith.constant 0 : index
    %67 = vector.load %arg9[%c0_34, %c0_35] : memref<32x32xbf16, #tpu.memory_space<vmem>>, vector<16x32xbf16>
    %cst_36 = arith.constant dense<0.000000e+00> : vector<16x32xf32>
    %68 = tpu.matmul %66, %67, %cst_36 {dimension_numbers = #tpu.dot_dimension_numbers<[1], [0], [0], [1], [0, 0, 1, 1], [], []>} : vector<16x16xbf16>, vector<16x32xbf16>, vector<16x32xf32> -> vector<16x32xf32>
    %69 = arith.addf %44, %68 : vector<16x32xf32>
    %70 = vector.extract_strided_slice %32 {offsets = [0, 16], sizes = [16, 16], strides = [1, 1]} : vector<16x32xf32> to vector<16x16xf32>
    %71 = arith.truncf %70 : vector<16x16xf32> to vector<16x16xbf16>
    %72 = vector.extract_strided_slice %34 {offsets = [0, 16], sizes = [8, 16], strides = [1, 1]} : vector<8x32xf32> to vector<8x16xf32>
    %73 = arith.truncf %72 : vector<8x16xf32> to vector<8x16xbf16>
    %74 = vector.extract_strided_slice %36 {offsets = [0, 16], sizes = [8, 16], strides = [1, 1]} : vector<8x32xf32> to vector<8x16xf32>
    %75 = arith.truncf %74 : vector<8x16xf32> to vector<8x16xbf16>
    %cst_37 = arith.constant dense<0.000000e+00> : vector<16x8xf32>
    %76 = tpu.matmul %71, %73, %cst_37 {dimension_numbers = #tpu.dot_dimension_numbers<[1], [1], [0], [0], [0, 0, 1, 0], [], []>} : vector<16x16xbf16>, vector<8x16xbf16>, vector<16x8xf32> -> vector<16x8xf32>
    %77 = vector.broadcast %43 : vector<1x8xf32> to vector<16x8xf32>
    %78 = arith.addf %76, %77 : vector<16x8xf32>
    %cst_38 = arith.constant dense<0xFF800000> : vector<16xf32>
    %79 = vector.multi_reduction <maximumf>, %78, %cst_38 [1] : vector<16x8xf32> to vector<16xf32>
    %80 = vector.shape_cast %79 : vector<16xf32> to vector<16x1xf32>
    %81 = vector.broadcast %80 : vector<16x1xf32> to vector<16x8xf32>
    %82 = arith.subf %78, %81 : vector<16x8xf32>
    %83 = math.exp %82 : vector<16x8xf32>
    %cst_39 = arith.constant dense<0.000000e+00> : vector<16xf32>
    %84 = vector.multi_reduction <add>, %83, %cst_39 [1] : vector<16x8xf32> to vector<16xf32>
    %85 = vector.shape_cast %84 : vector<16xf32> to vector<16x1xf32>
    %86 = tpu.reciprocal %85 {approx = true} : vector<16x1xf32> -> vector<16x1xf32>
    %87 = vector.broadcast %86 : vector<16x1xf32> to vector<16x8xf32>
    %88 = arith.mulf %83, %87 : vector<16x8xf32>
    %89 = arith.truncf %88 : vector<16x8xf32> to vector<16x8xbf16>
    %cst_40 = arith.constant dense<0.000000e+00> : vector<16x16xf32>
    %90 = tpu.matmul %89, %75, %cst_40 {dimension_numbers = #tpu.dot_dimension_numbers<[1], [0], [0], [1], [0, 0, 1, 1], [], []>} : vector<16x8xbf16>, vector<8x16xbf16>, vector<16x16xf32> -> vector<16x16xf32>
    %91 = arith.truncf %90 : vector<16x16xf32> to vector<16x16xbf16>
    %c16 = arith.constant 16 : index
    %c0_41 = arith.constant 0 : index
    %92 = vector.load %arg9[%c16, %c0_41] : memref<32x32xbf16, #tpu.memory_space<vmem>>, vector<16x32xbf16>
    %cst_42 = arith.constant dense<0.000000e+00> : vector<16x32xf32>
    %93 = tpu.matmul %91, %92, %cst_42 {dimension_numbers = #tpu.dot_dimension_numbers<[1], [0], [0], [1], [0, 0, 1, 1], [], []>} : vector<16x16xbf16>, vector<16x32xbf16>, vector<16x32xf32> -> vector<16x32xf32>
    %94 = arith.addf %69, %93 : vector<16x32xf32>
    %95 = arith.addf %1, %94 : vector<16x32xf32>
    %c0_43 = arith.constant 0 : index
    %c0_44 = arith.constant 0 : index
    %c0_45 = arith.constant 0 : index
    %96 = vector.load %arg10[%c0_43, %c0_44, %c0_45] : memref<1x16x32xf32, #tpu.memory_space<vmem>>, vector<1x16x32xf32>
    %97 = vector.shape_cast %96 : vector<1x16x32xf32> to vector<16x32xf32>
    %98 = vector.shape_cast %95 : vector<16x32xf32> to vector<1x16x32xf32>
    tpu.vector_store %arg10[%c0_43, %c0_44, %c0_45], %98 {strides = array<i32>} : memref<1x16x32xf32, #tpu.memory_space<vmem>>, vector<1x16x32xf32>,
    return
  }
  func.func @transform_0(%arg0: i32) -> (i32, i32, i32) {
    %c0_i32 = arith.constant 0 : i32
    %c0_i32_0 = arith.constant 0 : i32
    %c0_i32_1 = arith.constant 0 : i32
    return %arg0, %c0_i32, %c0_i32_0 : i32, i32, i32
  }
  func.func @transform_1(%arg0: i32) -> (i32, i32, i32) {
    %c0_i32 = arith.constant 0 : i32
    %c0_i32_0 = arith.constant 0 : i32
    %c0_i32_1 = arith.constant 0 : i32
    return %arg0, %c0_i32, %c0_i32_0 : i32, i32, i32
  }
  func.func @transform_2(%arg0: i32) -> (i32, i32, i32) {
    %c0_i32 = arith.constant 0 : i32
    %c0_i32_0 = arith.constant 0 : i32
    %c0_i32_1 = arith.constant 0 : i32
    return %arg0, %c0_i32, %c0_i32_0 : i32, i32, i32
  }
  func.func @transform_3(%arg0: i32) -> (i32, i32) {
    %c0_i32 = arith.constant 0 : i32
    %c0_i32_0 = arith.constant 0 : i32
    %c0_i32_1 = arith.constant 0 : i32
    return %c0_i32, %c0_i32_0 : i32, i32
  }
  func.func @transform_4(%arg0: i32) -> (i32, i32) {
    %c0_i32 = arith.constant 0 : i32
    %c0_i32_0 = arith.constant 0 : i32
    %c0_i32_1 = arith.constant 0 : i32
    return %c0_i32, %c0_i32_0 : i32, i32
  }
  func.func @transform_5(%arg0: i32) -> (i32, i32) {
    %c0_i32 = arith.constant 0 : i32
    %c0_i32_0 = arith.constant 0 : i32
    %c0_i32_1 = arith.constant 0 : i32
    return %c0_i32, %c0_i32_0 : i32, i32
  }
  func.func @transform_6(%arg0: i32) -> (i32, i32) {
    %c0_i32 = arith.constant 0 : i32
    %c0_i32_0 = arith.constant 0 : i32
    %c0_i32_1 = arith.constant 0 : i32
    return %c0_i32, %c0_i32_0 : i32, i32
  }
  func.func @transform_7(%arg0: i32) -> (i32, i32) {
    %c0_i32 = arith.constant 0 : i32
    %c0_i32_0 = arith.constant 0 : i32
    %c0_i32_1 = arith.constant 0 : i32
    return %c0_i32, %c0_i32_0 : i32, i32
  }
  func.func @transform_8(%arg0: i32) -> (i32, i32) {
    %c0_i32 = arith.constant 0 : i32
    %c0_i32_0 = arith.constant 0 : i32
    %c0_i32_1 = arith.constant 0 : i32
    return %c0_i32, %c0_i32_0 : i32, i32
  }
  func.func @transform_9(%arg0: i32) -> (i32, i32, i32) {
    %c0_i32 = arith.constant 0 : i32
    %c0_i32_0 = arith.constant 0 : i32
    %c0_i32_1 = arith.constant 0 : i32
    return %arg0, %c0_i32, %c0_i32_0 : i32, i32, i32
  }
}

module attributes {stable_mosaic.version = 11 : i64} {
  func.func @_ffn_block_kernel(%arg0: i32, %arg1: memref<32x32xf32, #tpu.memory_space<vmem>>, %arg2: memref<1x32xf32, #tpu.memory_space<vmem>>, %arg3: memref<1x32xf32, #tpu.memory_space<vmem>>, %arg4: memref<32x128xbf16, #tpu.memory_space<vmem>>, %arg5: memref<1x128xf32, #tpu.memory_space<vmem>>, %arg6: memref<128x32xbf16, #tpu.memory_space<vmem>>, %arg7: memref<1x32xf32, #tpu.memory_space<vmem>>, %arg8: memref<32x32xf32, #tpu.memory_space<vmem>>) attributes {dimension_semantics = [#tpu.dimension_semantics<parallel>], iteration_bounds = array<i64: 1>, scalar_prefetch = 0 : i64, scratch_operands = 0 : i64, tpu.core_type = #tpu.core_type<tc>, window_params = [{transform_indices = @transform_0, window_bounds = array<i64: 32, 32>}, {pipeline_mode = #tpu.pipeline_mode<synchronous>, transform_indices = @transform_1, window_bounds = array<i64: 1, 32>}, {pipeline_mode = #tpu.pipeline_mode<synchronous>, transform_indices = @transform_2, window_bounds = array<i64: 1, 32>}, {pipeline_mode = #tpu.pipeline_mode<synchronous>, transform_indices = @transform_3, window_bounds = array<i64: 32, 128>}, {pipeline_mode = #tpu.pipeline_mode<synchronous>, transform_indices = @transform_4, window_bounds = array<i64: 1, 128>}, {pipeline_mode = #tpu.pipeline_mode<synchronous>, transform_indices = @transform_5, window_bounds = array<i64: 128, 32>}, {pipeline_mode = #tpu.pipeline_mode<synchronous>, transform_indices = @transform_6, window_bounds = array<i64: 1, 32>}, {transform_indices = @transform_7, window_bounds = array<i64: 32, 32>}]} {
    %c0 = arith.constant 0 : index
    %c0_0 = arith.constant 0 : index
    %0 = vector.load %arg1[%c0, %c0_0] : memref<32x32xf32, #tpu.memory_space<vmem>>, vector<32x32xf32>
    %c0_1 = arith.constant 0 : index
    %c0_2 = arith.constant 0 : index
    %1 = vector.load %arg2[%c0_1, %c0_2] : memref<1x32xf32, #tpu.memory_space<vmem>>, vector<1x32xf32>
    %c0_3 = arith.constant 0 : index
    %c0_4 = arith.constant 0 : index
    %2 = vector.load %arg3[%c0_3, %c0_4] : memref<1x32xf32, #tpu.memory_space<vmem>>, vector<1x32xf32>
    %cst = arith.constant dense<0.000000e+00> : vector<32xf32>
    %3 = vector.multi_reduction <add>, %0, %cst [1] : vector<32x32xf32> to vector<32xf32>
    %4 = vector.shape_cast %3 : vector<32xf32> to vector<32x1xf32>
    %cst_5 = arith.constant 3.200000e+01 : f32
    %5 = vector.broadcast %cst_5 : f32 to vector<32x1xf32>
    %6 = arith.divf %4, %5 : vector<32x1xf32>
    %7 = vector.broadcast %6 : vector<32x1xf32> to vector<32x32xf32>
    %8 = arith.subf %0, %7 : vector<32x32xf32>
    %9 = arith.mulf %8, %8 : vector<32x32xf32>
    %cst_6 = arith.constant dense<0.000000e+00> : vector<32xf32>
    %10 = vector.multi_reduction <add>, %9, %cst_6 [1] : vector<32x32xf32> to vector<32xf32>
    %11 = vector.shape_cast %10 : vector<32xf32> to vector<32x1xf32>
    %cst_7 = arith.constant 3.200000e+01 : f32
    %12 = vector.broadcast %cst_7 : f32 to vector<32x1xf32>
    %13 = arith.divf %11, %12 : vector<32x1xf32>
    %14 = vector.broadcast %6 : vector<32x1xf32> to vector<32x32xf32>
    %15 = arith.subf %0, %14 : vector<32x32xf32>
    %cst_8 = arith.constant 9.99999974E-6 : f32
    %16 = vector.broadcast %cst_8 : f32 to vector<32x1xf32>
    %17 = arith.addf %13, %16 : vector<32x1xf32>
    %18 = math.rsqrt %17 : vector<32x1xf32>
    %19 = vector.broadcast %18 : vector<32x1xf32> to vector<32x32xf32>
    %20 = arith.mulf %15, %19 : vector<32x32xf32>
    %21 = vector.broadcast %1 : vector<1x32xf32> to vector<32x32xf32>
    %22 = arith.mulf %20, %21 : vector<32x32xf32>
    %23 = vector.broadcast %2 : vector<1x32xf32> to vector<32x32xf32>
    %24 = arith.addf %22, %23 : vector<32x32xf32>
    %25 = arith.truncf %24 : vector<32x32xf32> to vector<32x32xbf16>
    %c0_9 = arith.constant 0 : index
    %c0_10 = arith.constant 0 : index
    %26 = vector.load %arg4[%c0_9, %c0_10] : memref<32x128xbf16, #tpu.memory_space<vmem>>, vector<32x128xbf16>
    %cst_11 = arith.constant dense<0.000000e+00> : vector<32x128xf32>
    %27 = tpu.matmul %25, %26, %cst_11 {dimension_numbers = #tpu.dot_dimension_numbers<[1], [0], [0], [1], [0, 0, 1, 1], [], []>} : vector<32x32xbf16>, vector<32x128xbf16>, vector<32x128xf32> -> vector<32x128xf32>
    %c0_12 = arith.constant 0 : index
    %c0_13 = arith.constant 0 : index
    %28 = vector.load %arg5[%c0_12, %c0_13] : memref<1x128xf32, #tpu.memory_space<vmem>>, vector<1x128xf32>
    %29 = vector.broadcast %28 : vector<1x128xf32> to vector<32x128xf32>
    %30 = arith.addf %27, %29 : vector<32x128xf32>
    %31 = arith.mulf %30, %30 : vector<32x128xf32>
    %32 = arith.mulf %30, %31 : vector<32x128xf32>
    %cst_14 = arith.constant 4.471500e-02 : f32
    %33 = vector.broadcast %cst_14 : f32 to vector<32x128xf32>
    %34 = arith.mulf %33, %32 : vector<32x128xf32>
    %35 = arith.addf %30, %34 : vector<32x128xf32>
    %cst_15 = arith.constant 0.797884583 : f32
    %36 = vector.broadcast %cst_15 : f32 to vector<32x128xf32>
    %37 = arith.mulf %36, %35 : vector<32x128xf32>
    %38 = math.tanh %37 : vector<32x128xf32>
    %cst_16 = arith.constant 1.000000e+00 : f32
    %39 = vector.broadcast %cst_16 : f32 to vector<32x128xf32>
    %40 = arith.addf %39, %38 : vector<32x128xf32>
    %cst_17 = arith.constant 5.000000e-01 : f32
    %41 = vector.broadcast %cst_17 : f32 to vector<32x128xf32>
    %42 = arith.mulf %41, %40 : vector<32x128xf32>
    %43 = arith.mulf %30, %42 : vector<32x128xf32>
    %44 = arith.truncf %43 : vector<32x128xf32> to vector<32x128xbf16>
    %c0_18 = arith.constant 0 : index
    %c0_19 = arith.constant 0 : index
    %45 = vector.load %arg6[%c0_18, %c0_19] : memref<128x32xbf16, #tpu.memory_space<vmem>>, vector<128x32xbf16>
    %cst_20 = arith.constant dense<0.000000e+00> : vector<32x32xf32>
    %46 = tpu.matmul %44, %45, %cst_20 {dimension_numbers = #tpu.dot_dimension_numbers<[1], [0], [0], [1], [0, 0, 1, 1], [], []>} : vector<32x128xbf16>, vector<128x32xbf16>, vector<32x32xf32> -> vector<32x32xf32>
    %c0_21 = arith.constant 0 : index
    %c0_22 = arith.constant 0 : index
    %47 = vector.load %arg7[%c0_21, %c0_22] : memref<1x32xf32, #tpu.memory_space<vmem>>, vector<1x32xf32>
    %48 = vector.broadcast %47 : vector<1x32xf32> to vector<32x32xf32>
    %49 = arith.addf %46, %48 : vector<32x32xf32>
    %50 = arith.addf %0, %49 : vector<32x32xf32>
    %c0_23 = arith.constant 0 : index
    %c0_24 = arith.constant 0 : index
    %51 = vector.load %arg8[%c0_23, %c0_24] : memref<32x32xf32, #tpu.memory_space<vmem>>, vector<32x32xf32>
    tpu.vector_store %arg8[%c0_23, %c0_24], %50 {strides = array<i32>} : memref<32x32xf32, #tpu.memory_space<vmem>>, vector<32x32xf32>,
    return
  }
  func.func @transform_0(%arg0: i32) -> (i32, i32) {
    %c0_i32 = arith.constant 0 : i32
    %c0_i32_0 = arith.constant 0 : i32
    return %arg0, %c0_i32 : i32, i32
  }
  func.func @transform_1(%arg0: i32) -> (i32, i32) {
    %c0_i32 = arith.constant 0 : i32
    %c0_i32_0 = arith.constant 0 : i32
    %c0_i32_1 = arith.constant 0 : i32
    return %c0_i32, %c0_i32_0 : i32, i32
  }
  func.func @transform_2(%arg0: i32) -> (i32, i32) {
    %c0_i32 = arith.constant 0 : i32
    %c0_i32_0 = arith.constant 0 : i32
    %c0_i32_1 = arith.constant 0 : i32
    return %c0_i32, %c0_i32_0 : i32, i32
  }
  func.func @transform_3(%arg0: i32) -> (i32, i32) {
    %c0_i32 = arith.constant 0 : i32
    %c0_i32_0 = arith.constant 0 : i32
    %c0_i32_1 = arith.constant 0 : i32
    return %c0_i32, %c0_i32_0 : i32, i32
  }
  func.func @transform_4(%arg0: i32) -> (i32, i32) {
    %c0_i32 = arith.constant 0 : i32
    %c0_i32_0 = arith.constant 0 : i32
    %c0_i32_1 = arith.constant 0 : i32
    return %c0_i32, %c0_i32_0 : i32, i32
  }
  func.func @transform_5(%arg0: i32) -> (i32, i32) {
    %c0_i32 = arith.constant 0 : i32
    %c0_i32_0 = arith.constant 0 : i32
    %c0_i32_1 = arith.constant 0 : i32
    return %c0_i32, %c0_i32_0 : i32, i32
  }
  func.func @transform_6(%arg0: i32) -> (i32, i32) {
    %c0_i32 = arith.constant 0 : i32
    %c0_i32_0 = arith.constant 0 : i32
    %c0_i32_1 = arith.constant 0 : i32
    return %c0_i32, %c0_i32_0 : i32, i32
  }
  func.func @transform_7(%arg0: i32) -> (i32, i32) {
    %c0_i32 = arith.constant 0 : i32
    %c0_i32_0 = arith.constant 0 : i32
    return %arg0, %c0_i32 : i32, i32
  }
}

module attributes {stable_mosaic.version = 11 : i64} {
  func.func @_ln_logits_xent_kernel(%arg0: i32, %arg1: memref<32x32xf32, #tpu.memory_space<vmem>>, %arg2: memref<1x32xf32, #tpu.memory_space<vmem>>, %arg3: memref<1x32xf32, #tpu.memory_space<vmem>>, %arg4: memref<32x256xbf16, #tpu.memory_space<vmem>>, %arg5: memref<1x256xf32, #tpu.memory_space<vmem>>, %arg6: memref<32x1xi32, #tpu.memory_space<vmem>>, %arg7: memref<1x1xf32, #tpu.memory_space<vmem>>, %arg8: memref<1x1xf32, #tpu.memory_space<vmem>>) attributes {dimension_semantics = [#tpu.dimension_semantics<arbitrary>], iteration_bounds = array<i64: 1>, scalar_prefetch = 0 : i64, scratch_operands = 1 : i64, tpu.core_type = #tpu.core_type<tc>, window_params = [{transform_indices = @transform_0, window_bounds = array<i64: 32, 32>}, {pipeline_mode = #tpu.pipeline_mode<synchronous>, transform_indices = @transform_1, window_bounds = array<i64: 1, 32>}, {pipeline_mode = #tpu.pipeline_mode<synchronous>, transform_indices = @transform_2, window_bounds = array<i64: 1, 32>}, {pipeline_mode = #tpu.pipeline_mode<synchronous>, transform_indices = @transform_3, window_bounds = array<i64: 32, 256>}, {pipeline_mode = #tpu.pipeline_mode<synchronous>, transform_indices = @transform_4, window_bounds = array<i64: 1, 256>}, {transform_indices = @transform_5, window_bounds = array<i64: 32, 1>}, {pipeline_mode = #tpu.pipeline_mode<synchronous>, transform_indices = @transform_6, window_bounds = array<i64: 1, 1>}]} {
    %c0_i32 = arith.constant 0 : i32
    %0 = arith.cmpi eq, %arg0, %c0_i32 : i32
    %1 = arith.extui %0 : i1 to i32
    %c0_i32_0 = arith.constant 0 : i32
    %2 = arith.cmpi ne, %1, %c0_i32_0 : i32
    scf.if %2 {
      %cst_28 = arith.constant 0.000000e+00 : f32
      %63 = vector.broadcast %cst_28 : f32 to vector<1x1xf32>
      %c0_29 = arith.constant 0 : index
      %c0_30 = arith.constant 0 : index
      %64 = vector.load %arg8[%c0_29, %c0_30] : memref<1x1xf32, #tpu.memory_space<vmem>>, vector<1x1xf32>
      tpu.vector_store %arg8[%c0_29, %c0_30], %63 {strides = array<i32>} : memref<1x1xf32, #tpu.memory_space<vmem>>, vector<1x1xf32>,
    } else {
    }
    %c0 = arith.constant 0 : index
    %c0_1 = arith.constant 0 : index
    %3 = vector.load %arg1[%c0, %c0_1] : memref<32x32xf32, #tpu.memory_space<vmem>>, vector<32x32xf32>
    %c0_2 = arith.constant 0 : index
    %c0_3 = arith.constant 0 : index
    %4 = vector.load %arg2[%c0_2, %c0_3] : memref<1x32xf32, #tpu.memory_space<vmem>>, vector<1x32xf32>
    %c0_4 = arith.constant 0 : index
    %c0_5 = arith.constant 0 : index
    %5 = vector.load %arg3[%c0_4, %c0_5] : memref<1x32xf32, #tpu.memory_space<vmem>>, vector<1x32xf32>
    %cst = arith.constant dense<0.000000e+00> : vector<32xf32>
    %6 = vector.multi_reduction <add>, %3, %cst [1] : vector<32x32xf32> to vector<32xf32>
    %7 = vector.shape_cast %6 : vector<32xf32> to vector<32x1xf32>
    %cst_6 = arith.constant 3.200000e+01 : f32
    %8 = vector.broadcast %cst_6 : f32 to vector<32x1xf32>
    %9 = arith.divf %7, %8 : vector<32x1xf32>
    %10 = vector.broadcast %9 : vector<32x1xf32> to vector<32x32xf32>
    %11 = arith.subf %3, %10 : vector<32x32xf32>
    %12 = arith.mulf %11, %11 : vector<32x32xf32>
    %cst_7 = arith.constant dense<0.000000e+00> : vector<32xf32>
    %13 = vector.multi_reduction <add>, %12, %cst_7 [1] : vector<32x32xf32> to vector<32xf32>
    %14 = vector.shape_cast %13 : vector<32xf32> to vector<32x1xf32>
    %cst_8 = arith.constant 3.200000e+01 : f32
    %15 = vector.broadcast %cst_8 : f32 to vector<32x1xf32>
    %16 = arith.divf %14, %15 : vector<32x1xf32>
    %17 = vector.broadcast %9 : vector<32x1xf32> to vector<32x32xf32>
    %18 = arith.subf %3, %17 : vector<32x32xf32>
    %cst_9 = arith.constant 9.99999974E-6 : f32
    %19 = vector.broadcast %cst_9 : f32 to vector<32x1xf32>
    %20 = arith.addf %16, %19 : vector<32x1xf32>
    %21 = math.rsqrt %20 : vector<32x1xf32>
    %22 = vector.broadcast %21 : vector<32x1xf32> to vector<32x32xf32>
    %23 = arith.mulf %18, %22 : vector<32x32xf32>
    %24 = vector.broadcast %4 : vector<1x32xf32> to vector<32x32xf32>
    %25 = arith.mulf %23, %24 : vector<32x32xf32>
    %26 = vector.broadcast %5 : vector<1x32xf32> to vector<32x32xf32>
    %27 = arith.addf %25, %26 : vector<32x32xf32>
    %28 = arith.truncf %27 : vector<32x32xf32> to vector<32x32xbf16>
    %c0_10 = arith.constant 0 : index
    %c0_11 = arith.constant 0 : index
    %29 = vector.load %arg4[%c0_10, %c0_11] : memref<32x256xbf16, #tpu.memory_space<vmem>>, vector<32x256xbf16>
    %cst_12 = arith.constant dense<0.000000e+00> : vector<32x256xf32>
    %30 = tpu.matmul %28, %29, %cst_12 {dimension_numbers = #tpu.dot_dimension_numbers<[1], [0], [0], [1], [0, 0, 1, 1], [], []>} : vector<32x32xbf16>, vector<32x256xbf16>, vector<32x256xf32> -> vector<32x256xf32>
    %c0_13 = arith.constant 0 : index
    %c0_14 = arith.constant 0 : index
    %31 = vector.load %arg5[%c0_13, %c0_14] : memref<1x256xf32, #tpu.memory_space<vmem>>, vector<1x256xf32>
    %32 = vector.broadcast %31 : vector<1x256xf32> to vector<32x256xf32>
    %33 = arith.addf %30, %32 : vector<32x256xf32>
    %34 = tpu.iota {dimensions = array<i32: 1>} : vector<32x256xi32>
    %c0_15 = arith.constant 0 : index
    %c0_16 = arith.constant 0 : index
    %35 = vector.load %arg6[%c0_15, %c0_16] : memref<32x1xi32, #tpu.memory_space<vmem>>, vector<32x1xi32>
    %36 = vector.broadcast %35 : vector<32x1xi32> to vector<32x256xi32>
    %37 = arith.cmpi eq, %34, %36 : vector<32x256xi32>
    %cst_17 = arith.constant 0.000000e+00 : f32
    %38 = vector.broadcast %cst_17 : f32 to vector<32x256xf32>
    %39 = arith.select %37, %33, %38 : vector<32x256xi1>, vector<32x256xf32>
    %cst_18 = arith.constant dense<0.000000e+00> : vector<32xf32>
    %40 = vector.multi_reduction <add>, %39, %cst_18 [1] : vector<32x256xf32> to vector<32xf32>
    %41 = vector.shape_cast %40 : vector<32xf32> to vector<32x1xf32>
    %cst_19 = arith.constant dense<0xFF800000> : vector<32xf32>
    %42 = vector.multi_reduction <maximumf>, %33, %cst_19 [1] : vector<32x256xf32> to vector<32xf32>
    %43 = vector.shape_cast %42 : vector<32xf32> to vector<32x1xf32>
    %44 = vector.broadcast %43 : vector<32x1xf32> to vector<32x256xf32>
    %45 = arith.subf %33, %44 : vector<32x256xf32>
    %46 = math.exp %45 : vector<32x256xf32>
    %cst_20 = arith.constant dense<0.000000e+00> : vector<32xf32>
    %47 = vector.multi_reduction <add>, %46, %cst_20 [1] : vector<32x256xf32> to vector<32xf32>
    %48 = vector.shape_cast %47 : vector<32xf32> to vector<32x1xf32>
    %49 = math.log %48 : vector<32x1xf32>
    %50 = arith.addf %43, %49 : vector<32x1xf32>
    %c0_21 = arith.constant 0 : index
    %c0_22 = arith.constant 0 : index
    %51 = vector.load %arg8[%c0_21, %c0_22] : memref<1x1xf32, #tpu.memory_space<vmem>>, vector<1x1xf32>
    %52 = arith.subf %50, %41 : vector<32x1xf32>
    %53 = vector.shape_cast %52 : vector<32x1xf32> to vector<1x32x1xf32>
    %cst_23 = arith.constant dense<0.000000e+00> : vector<1xf32>
    %54 = vector.multi_reduction <add>, %53, %cst_23 [1, 2] : vector<1x32x1xf32> to vector<1xf32>
    %55 = vector.shape_cast %54 : vector<1xf32> to vector<1x1x1xf32>
    %56 = vector.extract %55[0, 0, 0] : f32 from vector<1x1x1xf32>
    %57 = vector.broadcast %56 : f32 to vector<1x1xf32>
    %58 = arith.addf %51, %57 : vector<1x1xf32>
    %c0_24 = arith.constant 0 : index
    %c0_25 = arith.constant 0 : index
    %59 = vector.load %arg8[%c0_24, %c0_25] : memref<1x1xf32, #tpu.memory_space<vmem>>, vector<1x1xf32>
    tpu.vector_store %arg8[%c0_24, %c0_25], %58 {strides = array<i32>} : memref<1x1xf32, #tpu.memory_space<vmem>>, vector<1x1xf32>,
    %c0_i32_26 = arith.constant 0 : i32
    %60 = arith.cmpi eq, %arg0, %c0_i32_26 : i32
    %61 = arith.extui %60 : i1 to i32
    %c0_i32_27 = arith.constant 0 : i32
    %62 = arith.cmpi ne, %61, %c0_i32_27 : i32
    scf.if %62 {
      %c0_28 = arith.constant 0 : index
      %c0_29 = arith.constant 0 : index
      %63 = vector.load %arg8[%c0_28, %c0_29] : memref<1x1xf32, #tpu.memory_space<vmem>>, vector<1x1xf32>
      %cst_30 = arith.constant 3.200000e+01 : f32
      %64 = vector.broadcast %cst_30 : f32 to vector<1x1xf32>
      %65 = arith.divf %63, %64 : vector<1x1xf32>
      %c0_31 = arith.constant 0 : index
      %c0_32 = arith.constant 0 : index
      %66 = vector.load %arg7[%c0_31, %c0_32] : memref<1x1xf32, #tpu.memory_space<vmem>>, vector<1x1xf32>
      tpu.vector_store %arg7[%c0_31, %c0_32], %65 {strides = array<i32>} : memref<1x1xf32, #tpu.memory_space<vmem>>, vector<1x1xf32>,
    } else {
    }
    return
  }
  func.func @transform_0(%arg0: i32) -> (i32, i32) {
    %c0_i32 = arith.constant 0 : i32
    %c0_i32_0 = arith.constant 0 : i32
    return %arg0, %c0_i32 : i32, i32
  }
  func.func @transform_1(%arg0: i32) -> (i32, i32) {
    %c0_i32 = arith.constant 0 : i32
    %c0_i32_0 = arith.constant 0 : i32
    %c0_i32_1 = arith.constant 0 : i32
    return %c0_i32, %c0_i32_0 : i32, i32
  }
  func.func @transform_2(%arg0: i32) -> (i32, i32) {
    %c0_i32 = arith.constant 0 : i32
    %c0_i32_0 = arith.constant 0 : i32
    %c0_i32_1 = arith.constant 0 : i32
    return %c0_i32, %c0_i32_0 : i32, i32
  }
  func.func @transform_3(%arg0: i32) -> (i32, i32) {
    %c0_i32 = arith.constant 0 : i32
    %c0_i32_0 = arith.constant 0 : i32
    %c0_i32_1 = arith.constant 0 : i32
    return %c0_i32, %c0_i32_0 : i32, i32
  }
  func.func @transform_4(%arg0: i32) -> (i32, i32) {
    %c0_i32 = arith.constant 0 : i32
    %c0_i32_0 = arith.constant 0 : i32
    %c0_i32_1 = arith.constant 0 : i32
    return %c0_i32, %c0_i32_0 : i32, i32
  }
  func.func @transform_5(%arg0: i32) -> (i32, i32) {
    %c0_i32 = arith.constant 0 : i32
    %c0_i32_0 = arith.constant 0 : i32
    return %arg0, %c0_i32 : i32, i32
  }
  func.func @transform_6(%arg0: i32) -> (i32, i32) {
    %c0_i32 = arith.constant 0 : i32
    %c0_i32_0 = arith.constant 0 : i32
    %c0_i32_1 = arith.constant 0 : i32
    return %c0_i32, %c0_i32_0 : i32, i32
  }
}

</mosaic_0001>

<bundles_post_ra>
// kernel: _lambda_.10
= control target key start
LH: loop header
LB: loop body
LE: loop exit
PB: predicated region body
PF: predicated region fallthrough
CT: control target
= control target key end

     0   :  { %vm20_vm0 = vcmask 261120   ;;  %s174_s0 = inlined_call_operand.vmem [shape: f32[32,32], index: 0, kind: input, shape index: {}]   ;;  %s175_s1 = inlined_call_operand.vmem [shape: f32[1,32], index: 1, kind: input, shape index: {}]   ;;  %s176_s2 = inlined_call_operand.vmem [shape: f32[1,32], index: 2, kind: input, shape index: {}]   ;;  %s177_s3 = inlined_call_operand.vmem [shape: f32[32,32], index: 3, kind: output, shape index: {}]  }
   0x1   :  { %v14_v0 = vld [vmem:[%s174_s0] sm:$0xff]  ;;  %v16_v1 = vld [vmem:[%s174_s0 + $0x10] sm:$0xff]  ;;  %v15_v2 = vld [vmem:[%s174_s0 + $0x8] sm:$0xff] }
   0x2   :  { %v21_v3 = vsel %vm20_vm0, %v14_v0, 0.0  ;;  %v27_v4 = vsel %vm20_vm0, %v16_v1, 0.0  ;;  %v17_v5 = vld [vmem:[%s174_s0 + $0x18] sm:$0xff]  ;;  %v24_v6 = vsel %vm20_vm0, %v15_v2, 0.0  ;;  %v102_v41 = vld [vmem:[%s175_s1] ss:$0 sm:$0xff] }
   0x3   :  { %22 = vadd.xlane.f32.xlu0 %v21_v3  ;;  %28 = vadd.xlane.f32.xlu1 %v27_v4  ;;  %v30_v7 = vsel %vm20_vm0, %v17_v5, 0.0  ;;  %v103_v43 = vld [vmem:[%s176_s2] ss:$0 sm:$0xff] }
   0x7   :  { %25 = vadd.xlane.f32.xlu0 %v24_v6  ;;  %31 = vadd.xlane.f32.xlu1 %v30_v7 }
  0x8c   :  { %v23_v8 = vpop.xlane.xlu0 %22  ;;  %v29_v9 = vpop.xlane.xlu1 %28 }
  0x8d   :  { %v34_v10 = vmul.f32 0.03125, %v23_v8  ;;  %v36_v11 = vmul.f32 0.03125, %v29_v9 }
  0x8f   :  { %v38_v12 = vsub.f32 %v14_v0, %v34_v10  ;;  %v40_v13 = vsub.f32 %v16_v1, %v36_v11 }
  0x90   :  { %v26_v14 = vpop.xlane.xlu0 %25  ;;  %v32_v15 = vpop.xlane.xlu1 %31 }
  0x91   :  { %v35_v16 = vmul.f32 0.03125, %v26_v14  ;;  %v37_v17 = vmul.f32 0.03125, %v32_v15  ;;  %v42_v18 = vmul.f32 %v38_v12, %v38_v12  ;;  %v44_v19 = vmul.f32 %v40_v13, %v40_v13 }
  0x93   :  { %v39_v20 = vsub.f32 %v15_v2, %v35_v16  ;;  %v41_v21 = vsub.f32 %v17_v5, %v37_v17  ;;  %v46_v22 = vsel %vm20_vm0, %v42_v18, 0.0  ;;  %v52_v23 = vsel %vm20_vm0, %v44_v19, 0.0 }
  0x94   :  { %47 = vadd.xlane.f32.xlu0 %v46_v22 }
  0x95   :  { %v43_v24 = vmul.f32 %v39_v20, %v39_v20  ;;  %v45_v25 = vmul.f32 %v41_v21, %v41_v21 }
  0x97   :  { %v49_v26 = vsel %vm20_vm0, %v43_v24, 0.0  ;;  %v55_v27 = vsel %vm20_vm0, %v45_v25, 0.0 }
  0x98   :  { %53 = vadd.xlane.f32.xlu0 %v52_v23  ;;  %50 = vadd.xlane.f32.xlu1 %v49_v26 }
  0x9c   :  { %56 = vadd.xlane.f32.xlu1 %v55_v27 }
 0x11d   :  { %v48_v28 = vpop.xlane.xlu0 %47 }
 0x11e   :  { %v58_v29 = vmul.f32 0.03125, %v48_v28 }
 0x120   :  { %v62_v30 = vadd.f32 1e-05, %v58_v29 }
 0x121   :  { %v51_v31 = vpop.xlane.xlu1 %50  ;;  %v54_v32 = vpop.xlane.xlu0 %53 }
 0x122   :  { %104 = vrsqrt.f32 %v62_v30  ;;  %v59_v33 = vmul.f32 0.03125, %v51_v31  ;;  %v60_v34 = vmul.f32 0.03125, %v54_v32 }
 0x124   :  { %v63_v35 = vadd.f32 1e-05, %v59_v33  ;;  %v64_v36 = vadd.f32 1e-05, %v60_v34 }
 0x125   :  { %v57_v37 = vpop.xlane.xlu1 %56 }
 0x126   :  { %106 = vrsqrt.f32 %v63_v35  ;;  %v61_v38 = vmul.f32 0.03125, %v57_v37 }
 0x127   :  { %108 = vrsqrt.f32 %v64_v36 }
 0x128   :  { %v65_v39 = vadd.f32 1e-05, %v61_v38 }
 0x12a   :  { %110 = vrsqrt.f32 %v65_v39 }
 0x12f   :  { %v105_v40 = vpop.eup %104 }
 0x130   :  { %v70_v42 = vmul.f32 %v105_v40, %v38_v12 }
 0x132   :  { %v80_v44 = vmul.f32 %v102_v41, %v70_v42 }
 0x133   :  { %v107_v45 = vpop.eup %106 }
 0x134   :  { %v109_v46 = vpop.eup %108  ;;  %v90_v47 = vadd.f32 %v103_v43, %v80_v44  ;;  %v71_v48 = vmul.f32 %v107_v45, %v39_v20 }
 0x135   :  { %v72_v49 = vmul.f32 %v109_v46, %v40_v13 }
 0x136   :  { %94 = vst.msk [vmem:[%s177_s3] sm:$0xff] %vm20_vm0, %v90_v47  ;;  %v81_v50 = vmul.f32 %v102_v41, %v71_v48 }
 0x137   :  { %v111_v51 = vpop.eup %110  ;;  %v82_v52 = vmul.f32 %v102_v41, %v72_v49 }
 0x138   :  { %v91_v53 = vadd.f32 %v103_v43, %v81_v50  ;;  %v73_v54 = vmul.f32 %v111_v51, %v41_v21 }
 0x139   :  { %v92_v55 = vadd.f32 %v103_v43, %v82_v52 }
 0x13a   :  { %95 = vst.msk [vmem:[%s177_s3 + $0x8] sm:$0xff] %vm20_vm0, %v91_v53  ;;  %v83_v56 = vmul.f32 %v102_v41, %v73_v54 }
 0x13b   :  { %96 = vst.msk [vmem:[%s177_s3 + $0x10] sm:$0xff] %vm20_vm0, %v92_v55 }
 0x13c   :  { %v93_v57 = vadd.f32 %v103_v43, %v83_v56 }
 0x13e   :  { %97 = vst.msk [vmem:[%s177_s3 + $0x18] sm:$0xff] %vm20_vm0, %v93_v57 }

// kernel: _lambda_.11
= control target key start
LH: loop header
LB: loop body
LE: loop exit
PB: predicated region body
PF: predicated region fallthrough
CT: control target
= control target key end

     0   :  { %s1126_s24 = smov 0   ;;  %s1252_s0 = inlined_call_operand.vmem [shape: f32[2,16,32], index: 0, kind: input, shape index: {}]   ;;  %s1253_s1 = inlined_call_operand.vmem [shape: f32[1,32], index: 1, kind: input, shape index: {}]   ;;  %s1254_s2 = inlined_call_operand.vmem [shape: f32[1,32], index: 2, kind: input, shape index: {}]   ;;  %s1255_s3 = inlined_call_operand.vmem [shape: bf16[32,32], index: 3, kind: input, shape index: {}]   ;;  %s1256_s4 = inlined_call_operand.vmem [shape: bf16[32,32], index: 4, kind: input, shape index: {}]   ;;  %s1257_s5 = inlined_call_operand.vmem [shape: bf16[32,32], index: 5, kind: input, shape index: {}]   ;;  %s1258_s6 = inlined_call_operand.vmem [shape: bf16[32,32], index: 6, kind: input, shape index: {}]   ;;  %s1259_s7 = inlined_call_operand.vmem [shape: f32[2,16,32], index: 7, kind: output, shape index: {}]  }
   0x1 LB: > { %s921_s25 = sadd.s32 4294967295, %s1080_s24   ;;  %p925_p0 = scmp.ge.s32.totalorder %s1080_s24, 1  ;;  %s1080_s24 = sphi %s1126_s24, %s17_s24  }
   0x2   : > { %p237_p1 = scmp.lt.s32.totalorder %s1080_s24, 3 }
   0x4   : > { %p238_p2 = pnand %p925_p0, %p237_p1 }
   0x5   : > { %p269_p3 = scmp.lt.s32.totalorder (!%p238_p2), %s921_s25, 1  ;;  %s1084_s23 = smov (!%p238_p2), 112  }
   0x6   : > { %241 = sbr.rel (%p238_p2) target bundleno = 1565 (0x61d), region = 48 }
   0xb   : > { %s1261_s25 = smov (!%p269_p3, %s921_s25), 1  ;;  %vm284_vm0 = vcmask 261120   ;;  %v1046_v14 = vld [vmem:[%s1255_s3 + $0x8] sm:$0xff]   ;;  %v1082_v16 = vmov 0.0   ;;  %v1048_v17 = vld [vmem:[%s1255_s3] sm:$0xff]   ;;  %vm1083_vm1 = vmmov 0   ;;  %v505_v59 = vlaneseq }
   0xc   : > { %s951_s26 = sshll.u32 %s1261_s25, 4  ;;  %v1047_v15 = vld [vmem:[%s1256_s4 + $0x8] sm:$0xff]   ;;  %974 = vmatprep.subr.bf16.mxu0 %v1082_v16  ;;  %982 = vmatprep.subr.bf16.mxu1 %v1082_v16  ;;  %v1049_v18 = vld [vmem:[%s1256_s4] sm:$0xff]   ;;  %vm517_vm2 = vcmask 130048   ;;  %v1085_v63 = vmov -1e+30  }
   0xd   : > { %s273_s29 = scalar_lea.vmem %s1252_s0, %s951_s26  ;;  %975 = vmatpush3.bf16.msra.mxu0 %v1046_v14  ;;  %983 = vmatpush3.bf16.msra.mxu1 %v1047_v15  ;;  %v930_v27 = vld [vmem:[%s1253_s1] ss:$0 sm:$0xff]  ;;  %v1050_v35 = vld [vmem:[%s1257_s5 + $0x8] sm:$0xff]   ;;  %v506_v60 = vshrl.u32 %v505_v59, 7  ;;  %v509_v61 = vand.u32 127, %v505_v59  ;;  %s278_s10 = scalar_lea.vmem %s1259_s7, %s951_s26 }
   0xe   : > { %v1142_v0 = vld [vmem:[%s273_s29] sm:$0xff]  ;;  %v1144_v1 = vld [vmem:[%s273_s29 + $0x8] sm:$0xff]  ;;  %976 = vmatprep.subr.bf16.mxu0 %v1082_v16  ;;  %984 = vmatprep.subr.bf16.mxu1 %v1082_v16 }
   0xf   : > { %v285_v2 = vsel %vm284_vm0, %v1142_v0, 0.0  ;;  %v288_v3 = vsel %vm284_vm0, %v1144_v1, 0.0  ;;  %978 = vmatprep.mubr.msk.bf16.mxu0 %vm1083_vm1, %v1082_v16  ;;  %986 = vmatprep.mubr.msk.bf16.mxu1 %vm1083_vm1, %v1082_v16  ;;  %v931_v31 = vld [vmem:[%s1254_s2] ss:$0 sm:$0xff]  ;;  %vm510_vm3 = vcmp.ge.s32.totalorder %v506_v60, %v509_v61  ;;  %v507_v62 = vadd.s32 8, %v506_v60 }
  0x10   : > { %286 = vadd.xlane.f32.xlu0 %v285_v2  ;;  %v1051_v37 = vld [vmem:[%s1257_s5] sm:$0xff]   ;;  %v512_v2 = vsel %vm510_vm3, 0.0, %v1085_v63 }
  0x11   : > { %977 = vmatpush3.bf16.msra.mxu0 %v1048_v17  ;;  %985 = vmatpush3.bf16.msra.mxu1 %v1049_v18  ;;  %vm511_vm4 = vcmp.ge.s32.totalorder %v507_v62, %v509_v61 }
  0x12   : > { %990 = vmatprep.subr.bf16.mxu0 %v1082_v16  ;;  %998 = vmatprep.subr.bf16.mxu1 %v1082_v16 }
  0x14   : > { %289 = vadd.xlane.f32.xlu0 %v288_v3 }
  0x99   : > { %v287_v4 = vpop.xlane.xlu0 %286 }
  0x9a   : > { %v292_v5 = vmul.f32 0.03125, %v287_v4 }
  0x9c   : > { %v294_v6 = vsub.f32 %v1142_v0, %v292_v5 }
  0x9d   : > { %v290_v7 = vpop.xlane.xlu0 %289 }
  0x9e   : > { %v293_v8 = vmul.f32 0.03125, %v290_v7  ;;  %v296_v9 = vmul.f32 %v294_v6, %v294_v6 }
  0xa0   : > { %v295_v10 = vsub.f32 %v1144_v1, %v293_v8  ;;  %v298_v11 = vsel %vm284_vm0, %v296_v9, 0.0 }
  0xa1   : > { %299 = vadd.xlane.f32.xlu1 %v298_v11 }
  0xa2   : > { %v297_v12 = vmul.f32 %v295_v10, %v295_v10 }
  0xa4   : > { %v301_v13 = vsel %vm284_vm0, %v297_v12, 0.0 }
  0xa5   : > { %302 = vadd.xlane.f32.xlu1 %v301_v13 }
 0x12a   : > { %v300_v19 = vpop.xlane.xlu1 %299 }
 0x12b   : > { %v304_v20 = vmul.f32 0.03125, %v300_v19 }
 0x12d   : > { %v306_v21 = vadd.f32 1e-05, %v304_v20 }
 0x12e   : > { %v303_v22 = vpop.xlane.xlu1 %302 }
 0x12f   : > { %1054 = vrsqrt.f32 %v306_v21  ;;  %v305_v23 = vmul.f32 0.03125, %v303_v22 }
 0x131   : > { %v307_v24 = vadd.f32 1e-05, %v305_v23 }
 0x133   : > { %1056 = vrsqrt.f32 %v307_v24 }
 0x13c   : > { %v1055_v25 = vpop.eup %1054 }
 0x13d   : > { %v310_v26 = vmul.f32 %v1055_v25, %v294_v6  ;;  %v513_v6 = vsel %vm511_vm4, 0.0, %v1085_v63 }
 0x13f   : > { %v318_v30 = vmul.f32 %v930_v27, %v310_v26 }
 0x140   : > { %v1057_v28 = vpop.eup %1056 }
 0x141   : > { %v311_v29 = vmul.f32 %v1057_v28, %v295_v10  ;;  %v326_v33 = vadd.f32 %v931_v31, %v318_v30 }
 0x143   : > { %v319_v32 = vmul.f32 %v930_v27, %v311_v29 }
 0x145   : > { %v327_v34 = vadd.f32 %v931_v31, %v319_v32 }
 0x147   : > { %v328_v36 = vpack.c.bf16 %v327_v34, %v326_v33 }
 0x149   : > { %979 = vmatmul.mubr.msk.bf16.vlgmr.msra.gmra.mxu0 %vm284_vm0, %v328_v36  ;;  %987 = vmatmul.mubr.msk.bf16.vlgmr.msra.gmra.mxu1 %vm284_vm0, %v328_v36 }
 0x14a   : > { %991 = vmatpush3.bf16.msra.mxu0 %v1050_v35  ;;  %994 = vmatprep.mubr.msk.bf16.mxu0 %vm1083_vm1, %v1082_v16 }
 0x14b   : > { %992 = vmatprep.subr.bf16.mxu0 %v1082_v16  ;;  %1000 = vmatprep.mubr.msk.bf16.mxu1 %vm1083_vm1, %v1082_v16 }
 0x14e   : > { %993 = vmatpush3.bf16.msra.mxu0 %v1051_v37 }
 0x14f   : > { %1004 = vmatprep.subr.bf16.mxu0 %v1082_v16 }
 0x151   : > { %995 = vmatmul.mubr.msk.bf16.vlgmr.msra.gmra.mxu0 %vm284_vm0, %v328_v36 }
 0x152   : > { %1006 = vmatprep.mubr.msk.bf16.mxu0 %vm1083_vm1, %v1082_v16 }
 0x209   : > { %v382_v38 = vpop.f32.mrf.mxu0  ;;  %v441_v39 = vpop.f32.mrf.mxu1 }
 0x20a   : > { %v389_v44 = vmul.f32 0.25, %v382_v38 }
 0x20b   : > { %v980_v40 = vpop.f32.mrf.mxu0  ;;  %v988_v41 = vpop.f32.mrf.mxu1 }
 0x20d   : > { %v385_v42 = vpop.f32.mrf.mxu0  ;;  %v444_v43 = vpop.f32.mrf.mxu1 }
 0x20e   : > { %v390_v45 = vmul.f32 0.25, %v385_v42  ;;  %v515_v46 = vpack.c.bf16 %v444_v43, %v441_v39 }
 0x20f   : > { %v981_v47 = vpop.f32.mrf.mxu0  ;;  %v989_v48 = vpop.f32.mrf.mxu1 }
 0x210   : > { %v514_v49 = vpack.c.bf16 %v390_v45, %v389_v44  ;;  %v522_v50 = vsel %vm517_vm2, %v515_v46, 0  ;;  %639 = vrot.lane.b32.xlu0 %v515_v46, %s1084_s23 }
 0x211   : > { %v498_v51 = vpop.f32.mrf.mxu0  ;;  %999 = vmatpush3.bf16.xpose.msra.mxu1 %v522_v50 }
 0x212   : > { %636 = vrot.lane.b32.xlu1 %v514_v49, %s1084_s23  ;;  %1010 = vmatprep.subr.bf16.mxu1 %v1082_v16 }
 0x213   : > { %v996_v52 = vpop.f32.mrf.mxu0 }
 0x215   : > { %v501_v53 = vpop.f32.mrf.mxu0 }
 0x216   : > { %v1203_v54 = vpack.c.bf16 %v501_v53, %v498_v51 }
 0x217   : > { %v997_v55 = vpop.f32.mrf.mxu0 }
 0x218   : > { %1001 = vmatmul.mubr.msk.bf16.vlgmr.msra.gmra.mxu1 %vm517_vm2, %v514_v49  ;;  %1005 = vmatpush3.bf16.msra.mxu0 %v1203_v54  ;;  %v1052_v55 = vld [vmem:[%s1258_s6] sm:$0xff]  }
 0x219   : > { %1012 = vmatprep.mubr.msk.bf16.mxu1 %vm1083_vm1, %v1082_v16  ;;  %1016 = vmatprep.subr.bf16.mxu0 %v1082_v16 }
 0x282   : > { %v640_v56 = vpop.permute.xlu0 %639 }
 0x283   : > { %v645_v57 = vsel %vm517_vm2, %v640_v56, 0 }
 0x284   : > { %1011 = vmatpush3.bf16.xpose.msra.mxu1 %v645_v57  ;;  %v637_v58 = vpop.permute.xlu1 %636  ;;  %v1053_v57 = vld [vmem:[%s1258_s6 + $0x8] sm:$0xff]  }
 0x285   : > { %1022 = vmatprep.subr.bf16.mxu1 %v1082_v16 }
 0x28b   : > { %1013 = vmatmul.mubr.msk.bf16.vlgmr.msra.gmra.mxu1 %vm517_vm2, %v637_v58 }
 0x28c   : > { %1024 = vmatprep.mubr.msk.bf16.mxu1 %vm1083_vm1, %v1082_v16  ;;  %1023 = vmatpush3.bf16.msra.mxu1 %v1053_v57 }
 0x2d8   : > { %v558_v3 = vpop.f32.mrf.mxu1 }
 0x2d9   : > { %v559_v4 = vadd.f32 %v558_v3, %v512_v2 }
 0x2da   : > { %v1002_v5 = vpop.f32.mrf.mxu1 }
 0x2db   : > { %v565_v7 = vsel %vm517_vm2, %v559_v4, -inf }
 0x2dc   : > { %566 = vmax.xlane.f32.xlu1 %v565_v7  ;;  %v561_v8 = vpop.f32.mrf.mxu1 }
 0x2dd   : > { %v562_v9 = vadd.f32 %v561_v8, %v513_v6 }
 0x2de   : > { %v1003_v10 = vpop.f32.mrf.mxu1 }
 0x2df   : > { %v568_v11 = vsel %vm517_vm2, %v562_v9, -inf }
 0x2e0   : > { %569 = vmax.xlane.f32.xlu0 %v568_v11 }
 0x34b   : > { %v681_v12 = vpop.f32.mrf.mxu1 }
 0x34c   : > { %v682_v13 = vadd.f32 %v681_v12, %v512_v2 }
 0x34d   : > { %v1014_v14 = vpop.f32.mrf.mxu1 }
 0x34e   : > { %v688_v15 = vsel %vm517_vm2, %v682_v13, -inf }
 0x34f   : > { %689 = vmax.xlane.f32.xlu0 %v688_v15  ;;  %v684_v17 = vpop.f32.mrf.mxu1 }
 0x350   : > { %v685_v18 = vadd.f32 %v684_v17, %v513_v6 }
 0x351   : > { %v1015_v19 = vpop.f32.mrf.mxu1 }
 0x352   : > { %v691_v20 = vsel %vm517_vm2, %v685_v18, -inf }
 0x353   : > { %692 = vmax.xlane.f32.xlu1 %v691_v20 }
 0x365   : > { %v567_v21 = vpop.xlane.xlu1 %566 }
 0x366   : > { %v571_v22 = vsub.f32 %v559_v4, %v567_v21 }
 0x368   : > { %v573_v23 = vmul.f32 1.442695, %v571_v22 }
 0x369   : > { %v570_v24 = vpop.xlane.xlu0 %569 }
 0x36a   : > { %1058 = vpow2.f32 %v573_v23  ;;  %v572_v25 = vsub.f32 %v562_v9, %v570_v24 }
 0x36c   : > { %v575_v26 = vmul.f32 1.442695, %v572_v25 }
 0x36e   : > { %1060 = vpow2.f32 %v575_v26 }
 0x377   : > { %v1059_v27 = vpop.eup %1058 }
 0x378   : > { %v577_v28 = vsel %vm517_vm2, %v1059_v27, 0.0 }
 0x379   : > { %578 = vadd.xlane.f32.xlu0 %v577_v28 }
 0x37b   : > { %v1061_v29 = vpop.eup %1060 }
 0x37c   : > { %v580_v30 = vsel %vm517_vm2, %v1061_v29, 0.0 }
 0x37d   : > { %581 = vadd.xlane.f32.xlu1 %v580_v30 }
 0x3d8   : > { %v690_v31 = vpop.xlane.xlu0 %689 }
 0x3d9   : > { %v694_v32 = vsub.f32 %v682_v13, %v690_v31 }
 0x3db   : > { %v696_v33 = vmul.f32 1.442695, %v694_v32 }
 0x3dc   : > { %v693_v34 = vpop.xlane.xlu1 %692 }
 0x3dd   : > { %1062 = vpow2.f32 %v696_v33  ;;  %v695_v35 = vsub.f32 %v685_v18, %v693_v34 }
 0x3df   : > { %v698_v36 = vmul.f32 1.442695, %v695_v35 }
 0x3e1   : > { %1064 = vpow2.f32 %v698_v36 }
 0x3ea   : > { %v1063_v37 = vpop.eup %1062 }
 0x3eb   : > { %v700_v38 = vsel %vm517_vm2, %v1063_v37, 0.0 }
 0x3ec   : > { %701 = vadd.xlane.f32.xlu0 %v700_v38 }
 0x3ee   : > { %v1065_v39 = vpop.eup %1064 }
 0x3ef   : > { %v703_v40 = vsel %vm517_vm2, %v1065_v39, 0.0 }
 0x3f0   : > { %704 = vadd.xlane.f32.xlu1 %v703_v40 }
 0x402   : > { %v579_v41 = vpop.xlane.xlu0 %578  ;;  %712 = vrot.lane.b32.xlu0 %v1203_v54, %s1084_s23 }
 0x403   : > { %1066 = vrcp.f32 %v579_v41 }
 0x406   : > { %v582_v42 = vpop.xlane.xlu1 %581 }
 0x407   : > { %1068 = vrcp.f32 %v582_v42 }
 0x410   : > { %v1067_v43 = vpop.eup %1066 }
 0x411   : > { %v585_v45 = vmul.f32 %v1067_v43, %v1059_v27 }
 0x414   : > { %v1069_v44 = vpop.eup %1068 }
 0x415   : > { %v586_v46 = vmul.f32 %v1069_v44, %v1061_v29 }
 0x417   : > { %v587_v47 = vpack.c.bf16 %v586_v46, %v585_v45 }
 0x419   : > { %1007 = vmatmul.mubr.msk.bf16.vlgmr.msra.gmra.mxu0 %vm517_vm2, %v587_v47 }
 0x41a   : > { %1018 = vmatprep.mubr.msk.bf16.mxu0 %vm1083_vm1, %v1082_v16 }
 0x475   : > { %v702_v48 = vpop.xlane.xlu0 %701 }
 0x476   : > { %1070 = vrcp.f32 %v702_v48 }
 0x479   : > { %v705_v49 = vpop.xlane.xlu1 %704  ;;  %v713_v50 = vpop.permute.xlu0 %712 }
 0x47a   : > { %1072 = vrcp.f32 %v705_v49  ;;  %1017 = vmatpush3.bf16.msra.mxu0 %v713_v50 }
 0x47b   : > { %1028 = vmatprep.subr.bf16.mxu0 %v1082_v16 }
 0x483   : > { %v1071_v51 = vpop.eup %1070 }
 0x484   : > { %v708_v54 = vmul.f32 %v1071_v51, %v1063_v37 }
 0x487   : > { %v1073_v52 = vpop.eup %1072 }
 0x488   : > { %v709_v53 = vmul.f32 %v1073_v52, %v1065_v39 }
 0x48a   : > { %v710_v56 = vpack.c.bf16 %v709_v53, %v708_v54 }
 0x48c   : > { %1019 = vmatmul.mubr.msk.bf16.vlgmr.msra.gmra.mxu0 %vm517_vm2, %v710_v56 }
 0x48d   : > { %1029 = vmatpush3.bf16.msra.mxu0 %v1052_v55  ;;  %1030 = vmatprep.mubr.msk.bf16.mxu0 %vm1083_vm1, %v1082_v16 }
 0x4d9   : > { %v625_v58 = vpop.f32.mrf.mxu0 }
 0x4db   : > { %v1008_v59 = vpop.f32.mrf.mxu0 }
 0x4dd   : > { %v628_v60 = vpop.f32.mrf.mxu0 }
 0x4de   : > { %v632_v61 = vpack.c.bf16 %v628_v60, %v625_v58 }
 0x4df   : > { %v1009_v62 = vpop.f32.mrf.mxu0 }
 0x4e0   : > { %1031 = vmatmul.mubr.msk.bf16.vlgmr.msra.gmra.mxu0 %vm517_vm2, %v632_v61 }
 0x54c   : > { %v752_v63 = vpop.f32.mrf.mxu0 }
 0x54e   : > { %v1020_v2 = vpop.f32.mrf.mxu0 }
 0x550   : > { %v755_v3 = vpop.f32.mrf.mxu0 }
 0x551   : > { %v759_v4 = vpack.c.bf16 %v755_v3, %v752_v63 }
 0x552   : > { %v1021_v5 = vpop.f32.mrf.mxu0 }
 0x553   : > { %1025 = vmatmul.mubr.msk.bf16.vlgmr.msra.gmra.mxu1 %vm517_vm2, %v759_v4 }
 0x5a0   : > { %v855_v16 = vpop.f32.mrf.mxu0 }
 0x5a2   : > { %v1032_v6 = vpop.f32.mrf.mxu0 }
 0x5a4   : > { %v858_v7 = vpop.f32.mrf.mxu0 }
 0x5a6   : > { %v1033_v8 = vpop.f32.mrf.mxu0 }
 0x613   : > { %v805_v9 = vpop.f32.mrf.mxu1 }
 0x614   : > { %v856_v10 = vadd.f32 %v855_v16, %v805_v9 }
 0x615   : > { %v1026_v11 = vpop.f32.mrf.mxu1 }
 0x616   : > { %v862_v12 = vadd.f32 %v856_v10, %v1142_v0 }
 0x617   : > { %v808_v13 = vpop.f32.mrf.mxu1 }
 0x618   : > { %864 = vst.msk [vmem:[%s278_s10] sm:$0xff] %vm284_vm0, %v862_v12  ;;  %v859_v14 = vadd.f32 %v858_v7, %v808_v13 }
 0x619   : > { %v1027_v15 = vpop.f32.mrf.mxu1 }
 0x61a   : > { %v863_v17 = vadd.f32 %v859_v14, %v1144_v1 }
 0x61c   : > { %865 = vst.msk [vmem:[%s278_s10 + $0x8] sm:$0xff] %vm284_vm0, %v863_v17 }
 0x61d PF: > { %s17_s24 = sadd.s32 1, %s1080_s24  }
 0x61e   : > { %p14_p4 = scmp.ge.s32.totalorder %s17_s24, 4  }
 0x620   :  { %16 = sbr.rel (!%p14_p4) target bundleno = 1 (0x1), region = 78 }

// kernel: _lambda_.9
= control target key start
LH: loop header
LB: loop body
LE: loop exit
PB: predicated region body
PF: predicated region fallthrough
CT: control target
= control target key end

     0   :  { %v197_v0 = vmov 0.0   ;;  %vm198_vm0 = vmmov 0   ;;  %vm53_vm1 = vcmask 523264   ;;  %vm100_vm2 = vcmask 261120   ;;  %s258_s1 = inlined_call_operand.vmem [shape: bf16[64,32], index: 1, kind: input, shape index: {}]   ;;  %s259_s0 = inlined_call_operand.vmem [shape: f32[16,64], index: 0, kind: input, shape index: {}]   ;;  %s260_s2 = inlined_call_operand.vmem [shape: f32[1,32], index: 2, kind: input, shape index: {}]   ;;  %s261_s3 = inlined_call_operand.vmem [shape: f32[1,32], index: 3, kind: input, shape index: {}]   ;;  %s262_s4 = inlined_call_operand.vmem [shape: bf16[16,32], index: 4, kind: output, shape index: {}]  }
   0x1   :  { %175 = vmatprep.subr.bf16.mxu0 %v197_v0  ;;  %v189_v1 = vld [vmem:[%s258_s1 + $0x18] sm:$0xff]   ;;  %183 = vmatprep.mubr.msk.bf16.mxu0 %vm198_vm0, %v197_v0  ;;  %v190_v2 = vld [vmem:[%s258_s1 + $0x10] sm:$0xff]   ;;  %v191_v3 = vld [vmem:[%s258_s1 + $0x8] sm:$0xff]   ;;  %vm152_vm3 = vcmask 257024  }
   0x2   :  { %176 = vmatpush3.bf16.msra.mxu0 %v189_v1  ;;  %v192_v4 = vld [vmem:[%s258_s1] sm:$0xff]   ;;  %v19_v6 = vld [vmem:[%s259_s0 + $0x8] sm:$0xff] }
   0x3   :  { %177 = vmatprep.subr.bf16.mxu0 %v197_v0  ;;  %v18_v5 = vld [vmem:[%s259_s0] sm:$0xff] }
   0x4   :  { %v20_v7 = vpack.c.bf16 %v19_v6, %v18_v5  ;;  %v164_v31 = vld [vmem:[%s260_s2] ss:$0 sm:$0xff] }
   0x5   :  { %v165_v33 = vld [vmem:[%s261_s3] ss:$0 sm:$0xff] }
   0x6   :  { %178 = vmatpush3.bf16.msra.mxu0 %v190_v2 }
   0x7   :  { %179 = vmatprep.subr.bf16.mxu0 %v197_v0 }
   0xa   :  { %180 = vmatpush3.bf16.msra.mxu0 %v191_v3 }
   0xb   :  { %181 = vmatprep.subr.bf16.mxu0 %v197_v0 }
   0xe   :  { %182 = vmatpush3.bf16.msra.mxu0 %v192_v4 }
  0x11   :  { %184 = vmatmul.mubr.msk.bf16.vlgmr.msra.gmra.mxu0 %vm53_vm1, %v20_v7 }
  0xd1   :  { %v91_v8 = vpop.f32.mrf.mxu0 }
  0xd2   :  { %v101_v9 = vsel %vm100_vm2, %v91_v8, 0.0 }
  0xd3   :  { %102 = vadd.xlane.f32.xlu0 %v101_v9  ;;  %v185_v10 = vpop.f32.mrf.mxu0 }
  0xd5   :  { %v94_v11 = vpop.f32.mrf.mxu0 }
  0xd6   :  { %v104_v12 = vsel %vm100_vm2, %v94_v11, 0.0 }
  0xd7   :  { %105 = vadd.xlane.f32.xlu0 %v104_v12  ;;  %v186_v13 = vpop.f32.mrf.mxu0 }
 0x15c   :  { %v103_v14 = vpop.xlane.xlu0 %102 }
 0x15d   :  { %v108_v15 = vmul.f32 0.03125, %v103_v14 }
 0x15f   :  { %v110_v16 = vsub.f32 %v91_v8, %v108_v15 }
 0x160   :  { %v106_v17 = vpop.xlane.xlu0 %105 }
 0x161   :  { %v109_v18 = vmul.f32 0.03125, %v106_v17  ;;  %v112_v19 = vmul.f32 %v110_v16, %v110_v16 }
 0x163   :  { %v111_v20 = vsub.f32 %v94_v11, %v109_v18  ;;  %v114_v21 = vsel %vm100_vm2, %v112_v19, 0.0 }
 0x164   :  { %115 = vadd.xlane.f32.xlu1 %v114_v21 }
 0x165   :  { %v113_v22 = vmul.f32 %v111_v20, %v111_v20 }
 0x167   :  { %v117_v23 = vsel %vm100_vm2, %v113_v22, 0.0 }
 0x168   :  { %118 = vadd.xlane.f32.xlu1 %v117_v23 }
 0x1ed   :  { %v116_v24 = vpop.xlane.xlu1 %115 }
 0x1ee   :  { %v120_v25 = vmul.f32 0.03125, %v116_v24 }
 0x1f0   :  { %v122_v26 = vadd.f32 1e-05, %v120_v25 }
 0x1f1   :  { %v119_v27 = vpop.xlane.xlu1 %118 }
 0x1f2   :  { %193 = vrsqrt.f32 %v122_v26  ;;  %v121_v28 = vmul.f32 0.03125, %v119_v27 }
 0x1f4   :  { %v123_v29 = vadd.f32 1e-05, %v121_v28 }
 0x1f6   :  { %195 = vrsqrt.f32 %v123_v29 }
 0x1ff   :  { %v194_v30 = vpop.eup %193 }
 0x200   :  { %v126_v32 = vmul.f32 %v194_v30, %v110_v16 }
 0x202   :  { %v134_v34 = vmul.f32 %v164_v31, %v126_v32 }
 0x203   :  { %v196_v35 = vpop.eup %195 }
 0x204   :  { %v142_v36 = vadd.f32 %v165_v33, %v134_v34  ;;  %v127_v37 = vmul.f32 %v196_v35, %v111_v20 }
 0x206   :  { %v168_v38 = vpack.c.bf16 %v142_v36, %v142_v36  ;;  %v135_v39 = vmul.f32 %v164_v31, %v127_v37 }
 0x208   :  { %153 = vst.msk [vmem:[%s262_s4] sm:$0xf] %vm152_vm3, %v168_v38  ;;  %v143_v40 = vadd.f32 %v165_v33, %v135_v39 }
 0x20a   :  { %v169_v41 = vpack.c.bf16 %v143_v40, %v143_v40 }
 0x20c   :  { %154 = vst.msk [vmem:[%s262_s4 + $0x4] sm:$0xf] %vm152_vm3, %v169_v41 }

// kernel: _lambda_.12
= control target key start
LH: loop header
LB: loop body
LE: loop exit
PB: predicated region body
PF: predicated region fallthrough
CT: control target
= control target key end

     0   :  { %s1252_s30 = smov 0   ;;  %s1384_s0 = inlined_call_operand.vmem [shape: f32[2,16,32], index: 0, kind: input, shape index: {}]   ;;  %s1385_s1 = inlined_call_operand.vmem [shape: bf16[2,8,32], index: 1, kind: input, shape index: {}]   ;;  %s1386_s2 = inlined_call_operand.vmem [shape: f32[2,1,8], index: 2, kind: input, shape index: {}]   ;;  %s1387_s3 = inlined_call_operand.vmem [shape: f32[1,32], index: 3, kind: input, shape index: {}]   ;;  %s1388_s4 = inlined_call_operand.vmem [shape: f32[1,32], index: 4, kind: input, shape index: {}]   ;;  %s1389_s5 = inlined_call_operand.vmem [shape: bf16[32,32], index: 5, kind: input, shape index: {}]   ;;  %s1390_s6 = inlined_call_operand.vmem [shape: bf16[32,32], index: 6, kind: input, shape index: {}]   ;;  %s1391_s7 = inlined_call_operand.vmem [shape: bf16[32,32], index: 7, kind: input, shape index: {}]   ;;  %s1392_s8 = inlined_call_operand.vmem [shape: bf16[32,32], index: 8, kind: input, shape index: {}]   ;;  %s1393_s9 = inlined_call_operand.vmem [shape: f32[2,16,32], index: 9, kind: output, shape index: {}]  }
   0x1 LB: > { %s1036_s10 = sadd.s32 4294967295, %s1196_s30   ;;  %p1040_p0 = scmp.ge.s32.totalorder %s1196_s30, 1  ;;  %s1196_s30 = sphi %s1252_s30, %s19_s30  }
   0x2   : > { %p304_p1 = scmp.lt.s32.totalorder %s1196_s30, 3 }
   0x4   : > { %p305_p2 = pnand %p1040_p0, %p304_p1 }
   0x5   : > { %p347_p3 = scmp.lt.s32.totalorder (!%p305_p2), %s1036_s10, 1  ;;  %s1200_s13 = smov (!%p305_p2), 112  }
   0x6   : > { %308 = sbr.rel (%p305_p2) target bundleno = 1559 (0x617), region = 56 }
   0xb   : > { %s1395_s10 = smov (!%p347_p3, %s1036_s10), 1  ;;  %vm369_vm0 = vcmask 261120   ;;  %v1162_v14 = vld [vmem:[%s1390_s6 + $0x8] sm:$0xff]   ;;  %v1198_v16 = vmov 0.0   ;;  %vm1199_vm1 = vmmov 0   ;;  %v1163_v17 = vld [vmem:[%s1390_s6] sm:$0xff]   ;;  %v599_v55 = vlaneseq }
   0xc   : > { %s1067_s11 = sshll.u32 %s1395_s10, 4  ;;  %s1043_s17 = sshll.u32 %s1395_s10, 2  ;;  %v1164_v15 = vld [vmem:[%s1389_s5 + $0x8] sm:$0xff]   ;;  %1098 = vmatprep.subr.bf16.mxu1 %v1198_v16  ;;  %1102 = vmatprep.mubr.msk.bf16.mxu1 %vm1199_vm1, %v1198_v16  ;;  %v1165_v18 = vld [vmem:[%s1389_s5] sm:$0xff]   ;;  %vm604_vm2 = vcmask 130048   ;;  %vm652_vm4 = vcmask 64512  }
   0xd   : > { %s351_s14 = scalar_lea.vmem %s1384_s0, %s1067_s11  ;;  %1099 = vmatpush3.bf16.msra.mxu1 %v1162_v14  ;;  %1090 = vmatprep.subr.bf16.mxu0 %v1198_v16  ;;  %s355_s24 = scalar_lea.vmem %s1385_s1, %s1043_s17  ;;  %v1046_v28 = vld [vmem:[%s1387_s3] ss:$0 sm:$0xff]  ;;  %v1166_v52 = vld [vmem:[%s1391_s7 + $0x8] sm:$0xff]   ;;  %v600_v57 = vshrl.u32 %v599_v55, 7  ;;  %v1201_v59 = vmov -1e+30  }
   0xe   : > { %v1268_v0 = vld [vmem:[%s351_s14] sm:$0xff]  ;;  %v1270_v1 = vld [vmem:[%s351_s14 + $0x8] sm:$0xff]  ;;  %1100 = vmatprep.subr.bf16.mxu1 %v1198_v16  ;;  %1091 = vmatpush3.bf16.msra.mxu0 %v1164_v15  ;;  %s358_s20 = scalar_lea.vmem %s1386_s2, %s1395_s10  ;;  %vm679_vm5 = vcmask 1043456   ;;  %s363_s27 = scalar_lea.vmem %s1393_s9, %s1067_s11 }
   0xf   : > { %v370_v2 = vsel %vm369_vm0, %v1268_v0, 0.0  ;;  %v373_v3 = vsel %vm369_vm0, %v1270_v1, 0.0  ;;  %1092 = vmatprep.subr.bf16.mxu0 %v1198_v16  ;;  %1094 = vmatprep.mubr.msk.bf16.mxu0 %vm1199_vm1, %v1198_v16  ;;  %v413_v19 = vld [vmem:[%s355_s24] sm:$0xf]  ;;  %v601_v58 = vsub.s32 0, %v600_v57 }
  0x10   : > { %371 = vadd.xlane.f32.xlu0 %v370_v2  ;;  %v1047_v32 = vld [vmem:[%s1388_s4] ss:$0 sm:$0xff] }
  0x11   : > { %1101 = vmatpush3.bf16.msra.mxu1 %v1163_v17  ;;  %v1167_v53 = vld [vmem:[%s1391_s7] sm:$0xff]  }
  0x12   : > { %1093 = vmatpush3.bf16.msra.mxu0 %v1165_v18  ;;  %1114 = vmatprep.subr.bf16.mxu1 %v1198_v16  ;;  %v592_v56 = vld [vmem:[%s358_s20] sm:$0x1] }
  0x13   : > { %1106 = vmatprep.subr.bf16.mxu0 %v1198_v16  ;;  %vm593_vm3 = vcmp.gt.f32.partialorder %v592_v56, 0.5 }
  0x14   : > { %374 = vadd.xlane.f32.xlu0 %v373_v3  ;;  %1103 = vmatmul.mubr.msk.bf16.vlgmr.msra.gmra.mxu1 %vm369_vm0, %v413_v19  ;;  %v594_v60 = vsel %vm593_vm3, 0.0, %v1201_v59  ;;  %v1168_v59 = vld [vmem:[%s1392_s8] sm:$0xff]  }
  0x15   : > { %1116 = vmatprep.mubr.msk.bf16.mxu1 %vm1199_vm1, %v1198_v16  ;;  %v602_v61 = vrot.slane %v594_v60, %v601_v58 }
  0x99   : > { %v372_v4 = vpop.xlane.xlu0 %371 }
  0x9a   : > { %v377_v5 = vmul.f32 0.03125, %v372_v4 }
  0x9c   : > { %v379_v6 = vsub.f32 %v1268_v0, %v377_v5 }
  0x9d   : > { %v375_v7 = vpop.xlane.xlu0 %374 }
  0x9e   : > { %v378_v8 = vmul.f32 0.03125, %v375_v7  ;;  %v381_v9 = vmul.f32 %v379_v6, %v379_v6 }
  0xa0   : > { %v380_v10 = vsub.f32 %v1270_v1, %v378_v8  ;;  %v383_v11 = vsel %vm369_vm0, %v381_v9, 0.0 }
  0xa1   : > { %384 = vadd.xlane.f32.xlu1 %v383_v11 }
  0xa2   : > { %v382_v12 = vmul.f32 %v380_v10, %v380_v10 }
  0xa4   : > { %v386_v13 = vsel %vm369_vm0, %v382_v12, 0.0 }
  0xa5   : > { %387 = vadd.xlane.f32.xlu1 %v386_v13 }
  0xd4   : > { %v530_v37 = vpop.f32.mrf.mxu1 }
  0xd5   : > { %v596_v38 = vpack.c.bf16 %v530_v37, %v530_v37 }
  0xd6   : > { %v1104_v39 = vpop.f32.mrf.mxu1 }
  0xd7   : > { %v609_v40 = vsel %vm604_vm2, %v596_v38, 0  ;;  %731 = vrot.lane.b32.xlu0 %v596_v38, %s1200_s13 }
  0xd8   : > { %v533_v41 = vpop.f32.mrf.mxu1  ;;  %1115 = vmatpush3.bf16.xpose.msra.mxu1 %v609_v40 }
  0xd9   : > { %1126 = vmatprep.subr.bf16.mxu1 %v1198_v16 }
  0xda   : > { %v1105_v42 = vpop.f32.mrf.mxu1 }
 0x12a   : > { %v385_v20 = vpop.xlane.xlu1 %384 }
 0x12b   : > { %v389_v21 = vmul.f32 0.03125, %v385_v20 }
 0x12d   : > { %v391_v22 = vadd.f32 1e-05, %v389_v21 }
 0x12e   : > { %v388_v23 = vpop.xlane.xlu1 %387 }
 0x12f   : > { %1170 = vrsqrt.f32 %v391_v22  ;;  %v390_v24 = vmul.f32 0.03125, %v388_v23 }
 0x131   : > { %v392_v25 = vadd.f32 1e-05, %v390_v24 }
 0x133   : > { %1172 = vrsqrt.f32 %v392_v25 }
 0x13c   : > { %v1171_v26 = vpop.eup %1170 }
 0x13d   : > { %v395_v27 = vmul.f32 %v1171_v26, %v379_v6 }
 0x13f   : > { %v403_v31 = vmul.f32 %v1046_v28, %v395_v27 }
 0x140   : > { %v1173_v29 = vpop.eup %1172 }
 0x141   : > { %v396_v30 = vmul.f32 %v1173_v29, %v380_v10  ;;  %v411_v34 = vadd.f32 %v1047_v32, %v403_v31 }
 0x143   : > { %v404_v33 = vmul.f32 %v1046_v28, %v396_v30 }
 0x145   : > { %v412_v35 = vadd.f32 %v1047_v32, %v404_v33 }
 0x147   : > { %v414_v36 = vpack.c.bf16 %v412_v35, %v411_v34 }
 0x149   : > { %1095 = vmatmul.mubr.msk.bf16.vlgmr.msra.gmra.mxu0 %vm369_vm0, %v414_v36  ;;  %v732_v46 = vpop.permute.xlu0 %731 }
 0x14a   : > { %1110 = vmatprep.mubr.msk.bf16.mxu0 %vm1199_vm1, %v1198_v16  ;;  %v737_v51 = vsel %vm604_vm2, %v732_v46, 0  ;;  %1107 = vmatpush3.bf16.msra.mxu0 %v1166_v52 }
 0x14b   : > { %1108 = vmatprep.subr.bf16.mxu0 %v1198_v16 }
 0x14e   : > { %1109 = vmatpush3.bf16.msra.mxu0 %v1167_v53 }
 0x14f   : > { %1120 = vmatprep.subr.bf16.mxu0 %v1198_v16 }
 0x151   : > { %1111 = vmatmul.mubr.msk.bf16.vlgmr.msra.gmra.mxu0 %vm369_vm0, %v413_v19 }
 0x152   : > { %1122 = vmatprep.mubr.msk.bf16.mxu0 %vm1199_vm1, %v1198_v16 }
 0x209   : > { %v468_v43 = vpop.f32.mrf.mxu0 }
 0x20a   : > { %v475_v47 = vmul.f32 0.25, %v468_v43 }
 0x20b   : > { %v1096_v44 = vpop.f32.mrf.mxu0 }
 0x20d   : > { %v471_v45 = vpop.f32.mrf.mxu0 }
 0x20e   : > { %v476_v48 = vmul.f32 0.25, %v471_v45 }
 0x20f   : > { %v1097_v49 = vpop.f32.mrf.mxu0 }
 0x210   : > { %v595_v50 = vpack.c.bf16 %v476_v48, %v475_v47 }
 0x211   : > { %v586_v27 = vpop.f32.mrf.mxu0 }
 0x212   : > { %728 = vrot.lane.b32.xlu1 %v595_v50, %s1200_s13  ;;  %1117 = vmatmul.mubr.msk.bf16.vlgmr.msra.gmra.mxu1 %vm604_vm2, %v595_v50  ;;  %v597_v28 = vpack.c.bf16 %v586_v27, %v586_v27  ;;  %v1169_v50 = vld [vmem:[%s1392_s8 + $0x8] sm:$0xff]  }
 0x213   : > { %1127 = vmatpush3.bf16.xpose.msra.mxu1 %v737_v51  ;;  %1128 = vmatprep.mubr.msk.bf16.mxu1 %vm1199_vm1, %v1198_v16  ;;  %v1112_v29 = vpop.f32.mrf.mxu0 }
 0x214   : > { %1138 = vmatprep.subr.bf16.mxu1 %v1198_v16  ;;  %v681_v30 = vsel %vm679_vm5, %v597_v28, 0 }
 0x215   : > { %v589_v31 = vpop.f32.mrf.mxu0  ;;  %1121 = vmatpush3.bf16.msra.mxu0 %v681_v30 }
 0x216   : > { %1132 = vmatprep.subr.bf16.mxu0 %v1198_v16 }
 0x217   : > { %v1113_v32 = vpop.f32.mrf.mxu0 }
 0x284   : > { %v729_v54 = vpop.permute.xlu1 %728 }
 0x285   : > { %1129 = vmatmul.mubr.msk.bf16.vlgmr.msra.gmra.mxu1 %vm604_vm2, %v729_v54 }
 0x286   : > { %1140 = vmatprep.mubr.msk.bf16.mxu1 %vm1199_vm1, %v1198_v16  ;;  %1139 = vmatpush3.bf16.msra.mxu1 %v1169_v50 }
 0x2d2   : > { %v645_v62 = vpop.f32.mrf.mxu1 }
 0x2d3   : > { %v646_v63 = vadd.f32 %v645_v62, %v602_v61 }
 0x2d4   : > { %v1118_v2 = vpop.f32.mrf.mxu1 }
 0x2d5   : > { %v653_v3 = vsel %vm652_vm4, %v646_v63, -inf }
 0x2d6   : > { %654 = vmax.xlane.f32.xlu1 %v653_v3  ;;  %v648_v4 = vpop.f32.mrf.mxu1 }
 0x2d7   : > { %v649_v5 = vadd.f32 %v648_v4, %v602_v61 }
 0x2d8   : > { %v1119_v6 = vpop.f32.mrf.mxu1 }
 0x2d9   : > { %v656_v7 = vsel %vm652_vm4, %v649_v5, -inf }
 0x2da   : > { %657 = vmax.xlane.f32.xlu0 %v656_v7 }
 0x345   : > { %v773_v8 = vpop.f32.mrf.mxu1 }
 0x346   : > { %v774_v9 = vadd.f32 %v773_v8, %v602_v61 }
 0x347   : > { %v1130_v10 = vpop.f32.mrf.mxu1 }
 0x348   : > { %v780_v11 = vsel %vm652_vm4, %v774_v9, -inf }
 0x349   : > { %781 = vmax.xlane.f32.xlu0 %v780_v11  ;;  %v776_v12 = vpop.f32.mrf.mxu1 }
 0x34a   : > { %v777_v13 = vadd.f32 %v776_v12, %v602_v61 }
 0x34b   : > { %v1131_v14 = vpop.f32.mrf.mxu1 }
 0x34c   : > { %v783_v15 = vsel %vm652_vm4, %v777_v13, -inf }
 0x34d   : > { %784 = vmax.xlane.f32.xlu1 %v783_v15 }
 0x35f   : > { %v655_v17 = vpop.xlane.xlu1 %654 }
 0x360   : > { %v659_v18 = vsub.f32 %v646_v63, %v655_v17 }
 0x362   : > { %v661_v19 = vmul.f32 1.442695, %v659_v18 }
 0x363   : > { %v658_v20 = vpop.xlane.xlu0 %657 }
 0x364   : > { %1174 = vpow2.f32 %v661_v19  ;;  %v660_v21 = vsub.f32 %v649_v5, %v658_v20 }
 0x366   : > { %v663_v22 = vmul.f32 1.442695, %v660_v21 }
 0x368   : > { %1176 = vpow2.f32 %v663_v22 }
 0x371   : > { %v1175_v23 = vpop.eup %1174 }
 0x372   : > { %v665_v24 = vsel %vm652_vm4, %v1175_v23, 0.0 }
 0x373   : > { %666 = vadd.xlane.f32.xlu0 %v665_v24 }
 0x375   : > { %v1177_v25 = vpop.eup %1176 }
 0x376   : > { %v668_v26 = vsel %vm652_vm4, %v1177_v25, 0.0 }
 0x377   : > { %669 = vadd.xlane.f32.xlu1 %v668_v26 }
 0x3d2   : > { %v782_v33 = vpop.xlane.xlu0 %781 }
 0x3d3   : > { %v786_v34 = vsub.f32 %v774_v9, %v782_v33 }
 0x3d5   : > { %v788_v35 = vmul.f32 1.442695, %v786_v34 }
 0x3d6   : > { %v785_v36 = vpop.xlane.xlu1 %784 }
 0x3d7   : > { %1178 = vpow2.f32 %v788_v35  ;;  %v787_v37 = vsub.f32 %v777_v13, %v785_v36 }
 0x3d9   : > { %v790_v38 = vmul.f32 1.442695, %v787_v37 }
 0x3db   : > { %1180 = vpow2.f32 %v790_v38 }
 0x3e4   : > { %v1179_v39 = vpop.eup %1178 }
 0x3e5   : > { %v792_v40 = vsel %vm652_vm4, %v1179_v39, 0.0 }
 0x3e6   : > { %793 = vadd.xlane.f32.xlu0 %v792_v40 }
 0x3e8   : > { %v1181_v41 = vpop.eup %1180 }
 0x3e9   : > { %v795_v42 = vsel %vm652_vm4, %v1181_v41, 0.0 }
 0x3ea   : > { %796 = vadd.xlane.f32.xlu1 %v795_v42 }
 0x3fc   : > { %v667_v43 = vpop.xlane.xlu0 %666  ;;  %804 = vrot.lane.b32.xlu0 %v597_v28, %s1200_s13 }
 0x3fd   : > { %1182 = vrcp.f32 %v667_v43 }
 0x400   : > { %v670_v44 = vpop.xlane.xlu1 %669 }
 0x401   : > { %1184 = vrcp.f32 %v670_v44 }
 0x40a   : > { %v1183_v45 = vpop.eup %1182 }
 0x40b   : > { %v673_v47 = vmul.f32 %v1183_v45, %v1175_v23 }
 0x40e   : > { %v1185_v46 = vpop.eup %1184 }
 0x40f   : > { %v674_v48 = vmul.f32 %v1185_v46, %v1177_v25 }
 0x411   : > { %v675_v49 = vpack.c.bf16 %v674_v48, %v673_v47 }
 0x413   : > { %1123 = vmatmul.mubr.msk.bf16.vlgmr.msra.gmra.mxu0 %vm652_vm4, %v675_v49 }
 0x414   : > { %1134 = vmatprep.mubr.msk.bf16.mxu0 %vm1199_vm1, %v1198_v16 }
 0x46f   : > { %v794_v51 = vpop.xlane.xlu0 %793 }
 0x470   : > { %1186 = vrcp.f32 %v794_v51 }
 0x473   : > { %v797_v52 = vpop.xlane.xlu1 %796  ;;  %v805_v53 = vpop.permute.xlu0 %804 }
 0x474   : > { %1188 = vrcp.f32 %v797_v52  ;;  %v810_v54 = vsel %vm679_vm5, %v805_v53, 0 }
 0x475   : > { %1133 = vmatpush3.bf16.msra.mxu0 %v810_v54 }
 0x476   : > { %1144 = vmatprep.subr.bf16.mxu0 %v1198_v16 }
 0x47d   : > { %v1187_v55 = vpop.eup %1186 }
 0x47e   : > { %v800_v58 = vmul.f32 %v1187_v55, %v1179_v39 }
 0x481   : > { %v1189_v56 = vpop.eup %1188 }
 0x482   : > { %v801_v57 = vmul.f32 %v1189_v56, %v1181_v41 }
 0x484   : > { %v802_v60 = vpack.c.bf16 %v801_v57, %v800_v58 }
 0x486   : > { %1135 = vmatmul.mubr.msk.bf16.vlgmr.msra.gmra.mxu0 %vm652_vm4, %v802_v60 }
 0x487   : > { %1145 = vmatpush3.bf16.msra.mxu0 %v1168_v59  ;;  %1146 = vmatprep.mubr.msk.bf16.mxu0 %vm1199_vm1, %v1198_v16 }
 0x4d3   : > { %v717_v61 = vpop.f32.mrf.mxu0 }
 0x4d5   : > { %v1124_v62 = vpop.f32.mrf.mxu0 }
 0x4d7   : > { %v720_v63 = vpop.f32.mrf.mxu0 }
 0x4d8   : > { %v724_v2 = vpack.c.bf16 %v720_v63, %v717_v61 }
 0x4d9   : > { %v1125_v3 = vpop.f32.mrf.mxu0 }
 0x4da   : > { %1147 = vmatmul.mubr.msk.bf16.vlgmr.msra.gmra.mxu0 %vm604_vm2, %v724_v2 }
 0x546   : > { %v846_v4 = vpop.f32.mrf.mxu0 }
 0x548   : > { %v1136_v5 = vpop.f32.mrf.mxu0 }
 0x54a   : > { %v849_v6 = vpop.f32.mrf.mxu0 }
 0x54b   : > { %v853_v7 = vpack.c.bf16 %v849_v6, %v846_v4 }
 0x54c   : > { %v1137_v8 = vpop.f32.mrf.mxu0 }
 0x54d   : > { %1141 = vmatmul.mubr.msk.bf16.vlgmr.msra.gmra.mxu1 %vm604_vm2, %v853_v7 }
 0x59a   : > { %v949_v9 = vpop.f32.mrf.mxu0 }
 0x59c   : > { %v1148_v10 = vpop.f32.mrf.mxu0 }
 0x59e   : > { %v952_v11 = vpop.f32.mrf.mxu0 }
 0x5a0   : > { %v1149_v12 = vpop.f32.mrf.mxu0 }
 0x60d   : > { %v899_v16 = vpop.f32.mrf.mxu1 }
 0x60e   : > { %v950_v13 = vadd.f32 %v949_v9, %v899_v16 }
 0x60f   : > { %v1142_v14 = vpop.f32.mrf.mxu1 }
 0x610   : > { %v956_v15 = vadd.f32 %v950_v13, %v1268_v0 }
 0x611   : > { %v902_v17 = vpop.f32.mrf.mxu1 }
 0x612   : > { %958 = vst.msk [vmem:[%s363_s27] sm:$0xff] %vm369_vm0, %v956_v15  ;;  %v953_v18 = vadd.f32 %v952_v11, %v902_v17 }
 0x613   : > { %v1143_v19 = vpop.f32.mrf.mxu1 }
 0x614   : > { %v957_v20 = vadd.f32 %v953_v18, %v1270_v1 }
 0x616   : > { %959 = vst.msk [vmem:[%s363_s27 + $0x8] sm:$0xff] %vm369_vm0, %v957_v20 }
 0x617 PF: > { %s19_s30 = sadd.s32 1, %s1196_s30  }
 0x618   : > { %p16_p4 = scmp.ge.s32.totalorder %s19_s30, 4  }
 0x61a   :  { %18 = sbr.rel (!%p16_p4) target bundleno = 1 (0x1), region = 92 }

// kernel: _lambda_.13
= control target key start
LH: loop header
LB: loop body
LE: loop exit
PB: predicated region body
PF: predicated region fallthrough
CT: control target
= control target key end

     0   :  { %vm33_vm0 = vcmask 261120   ;;  %s581_s0 = inlined_call_operand.vmem [shape: f32[32,32], index: 0, kind: input, shape index: {}]   ;;  %s582_s3 = inlined_call_operand.vmem [shape: bf16[32,128], index: 3, kind: input, shape index: {}]   ;;  %s583_s1 = inlined_call_operand.vmem [shape: f32[1,32], index: 1, kind: input, shape index: {}]   ;;  %s584_s2 = inlined_call_operand.vmem [shape: f32[1,32], index: 2, kind: input, shape index: {}]   ;;  %s585_s5 = inlined_call_operand.vmem [shape: bf16[128,32], index: 5, kind: input, shape index: {}]   ;;  %s586_s4 = inlined_call_operand.vmem [shape: f32[1,128], index: 4, kind: input, shape index: {}]   ;;  %s587_s6 = inlined_call_operand.vmem [shape: f32[1,32], index: 6, kind: input, shape index: {}]   ;;  %s588_s7 = inlined_call_operand.vmem [shape: f32[32,32], index: 7, kind: output, shape index: {}]  }
   0x1   :  { %v484_v0 = vld [vmem:[%s581_s0] sm:$0xff]  ;;  %v489_v1 = vld [vmem:[%s581_s0 + $0x10] sm:$0xff]  ;;  %v494_v2 = vld [vmem:[%s581_s0 + $0x8] sm:$0xff] }
   0x2   :  { %v34_v3 = vsel %vm33_vm0, %v484_v0, 0.0  ;;  %v40_v4 = vsel %vm33_vm0, %v489_v1, 0.0  ;;  %v503_v5 = vld [vmem:[%s581_s0 + $0x18] sm:$0xff]  ;;  %v37_v6 = vsel %vm33_vm0, %v494_v2, 0.0  ;;  %v415_v28 = vld [vmem:[%s582_s3 + $0x8] sm:$0xff]   ;;  %v416_v29 = vld [vmem:[%s582_s3] sm:$0xff]  }
   0x3   :  { %35 = vadd.xlane.f32.xlu0 %v34_v3  ;;  %41 = vadd.xlane.f32.xlu1 %v40_v4  ;;  %v43_v7 = vsel %vm33_vm0, %v503_v5, 0.0  ;;  %v357_v44 = vld [vmem:[%s583_s1] ss:$0 sm:$0xff]  ;;  %v417_v62 = vld [vmem:[%s585_s5 + $0x38] sm:$0xff]   ;;  %v418_v63 = vld [vmem:[%s585_s5 + $0x30] sm:$0xff]  }
   0x4   :  { %387 = vmatprep.subr.bf16.mxu0 %v415_v28  ;;  %v358_v49 = vld [vmem:[%s584_s2] ss:$0 sm:$0xff]  ;;  %395 = vmatprep.subr.bf16.mxu1 %v417_v62  ;;  %v419_v3 = vld [vmem:[%s585_s5 + $0x28] sm:$0xff]  }
   0x5   :  { %388 = vmatpush3.bf16.msra.mxu0 %v415_v28  ;;  %396 = vmatpush3.bf16.msra.mxu1 %v417_v62  ;;  %v420_v4 = vld [vmem:[%s585_s5 + $0x20] sm:$0xff]  }
   0x6   :  { %389 = vmatprep.subr.bf16.mxu0 %v416_v29  ;;  %397 = vmatprep.subr.bf16.mxu1 %v418_v63 }
   0x7   :  { %38 = vadd.xlane.f32.xlu0 %v37_v6  ;;  %44 = vadd.xlane.f32.xlu1 %v43_v7  ;;  %v421_v6 = vld [vmem:[%s585_s5 + $0x18] sm:$0xff]   ;;  %v422_v7 = vld [vmem:[%s585_s5 + $0x10] sm:$0xff]  }
   0x9   :  { %390 = vmatpush3.bf16.msra.mxu0 %v416_v29  ;;  %398 = vmatpush3.bf16.msra.mxu1 %v418_v63 }
   0xa   :  { %399 = vmatprep.subr.bf16.mxu1 %v419_v3 }
   0xd   :  { %400 = vmatpush3.bf16.msra.mxu1 %v419_v3 }
   0xe   :  { %401 = vmatprep.subr.bf16.mxu1 %v420_v4 }
  0x11   :  { %402 = vmatpush3.bf16.msra.mxu1 %v420_v4 }
  0x12   :  { %403 = vmatprep.subr.bf16.mxu1 %v421_v6 }
  0x15   :  { %404 = vmatpush3.bf16.msra.mxu1 %v421_v6 }
  0x16   :  { %405 = vmatprep.subr.bf16.mxu1 %v422_v7 }
  0x19   :  { %406 = vmatpush3.bf16.msra.mxu1 %v422_v7 }
  0x8c   :  { %v36_v8 = vpop.xlane.xlu0 %35  ;;  %v42_v9 = vpop.xlane.xlu1 %41 }
  0x8d   :  { %v47_v10 = vmul.f32 0.03125, %v36_v8  ;;  %v49_v11 = vmul.f32 0.03125, %v42_v9  ;;  %v423_v8 = vld [vmem:[%s585_s5 + $0x8] sm:$0xff]   ;;  %v424_v9 = vld [vmem:[%s585_s5] sm:$0xff]  }
  0x8e   :  { %407 = vmatprep.subr.bf16.mxu1 %v423_v8 }
  0x8f   :  { %v51_v12 = vsub.f32 %v484_v0, %v47_v10  ;;  %v53_v13 = vsub.f32 %v489_v1, %v49_v11  ;;  %408 = vmatpush3.bf16.msra.mxu1 %v423_v8  ;;  %v359_v10 = vld [vmem:[%s586_s4] ss:$0 sm:$0xff] }
  0x90   :  { %v39_v14 = vpop.xlane.xlu0 %38  ;;  %v45_v15 = vpop.xlane.xlu1 %44  ;;  %409 = vmatprep.subr.bf16.mxu1 %v424_v9 }
  0x91   :  { %v48_v16 = vmul.f32 0.03125, %v39_v14  ;;  %v50_v17 = vmul.f32 0.03125, %v45_v15  ;;  %v55_v18 = vmul.f32 %v51_v12, %v51_v12  ;;  %v57_v19 = vmul.f32 %v53_v13, %v53_v13 }
  0x93   :  { %v52_v20 = vsub.f32 %v494_v2, %v48_v16  ;;  %v54_v21 = vsub.f32 %v503_v5, %v50_v17  ;;  %v59_v22 = vsel %vm33_vm0, %v55_v18, 0.0  ;;  %v65_v23 = vsel %vm33_vm0, %v57_v19, 0.0  ;;  %410 = vmatpush3.bf16.msra.mxu1 %v424_v9 }
  0x94   :  { %60 = vadd.xlane.f32.xlu0 %v59_v22 }
  0x95   :  { %v56_v24 = vmul.f32 %v52_v20, %v52_v20  ;;  %v58_v25 = vmul.f32 %v54_v21, %v54_v21 }
  0x97   :  { %v62_v26 = vsel %vm33_vm0, %v56_v24, 0.0  ;;  %v68_v27 = vsel %vm33_vm0, %v58_v25, 0.0 }
  0x98   :  { %66 = vadd.xlane.f32.xlu0 %v65_v23  ;;  %63 = vadd.xlane.f32.xlu1 %v62_v26 }
  0x9c   :  { %69 = vadd.xlane.f32.xlu1 %v68_v27 }
 0x11d   :  { %v61_v30 = vpop.xlane.xlu0 %60 }
 0x11e   :  { %v71_v31 = vmul.f32 0.03125, %v61_v30 }
 0x120   :  { %v75_v32 = vadd.f32 1e-05, %v71_v31 }
 0x121   :  { %v64_v33 = vpop.xlane.xlu1 %63  ;;  %v67_v34 = vpop.xlane.xlu0 %66 }
 0x122   :  { %425 = vrsqrt.f32 %v75_v32  ;;  %v72_v35 = vmul.f32 0.03125, %v64_v33  ;;  %v73_v36 = vmul.f32 0.03125, %v67_v34 }
 0x124   :  { %v76_v37 = vadd.f32 1e-05, %v72_v35  ;;  %v77_v38 = vadd.f32 1e-05, %v73_v36 }
 0x125   :  { %v70_v39 = vpop.xlane.xlu1 %69 }
 0x126   :  { %427 = vrsqrt.f32 %v76_v37  ;;  %v74_v40 = vmul.f32 0.03125, %v70_v39 }
 0x127   :  { %429 = vrsqrt.f32 %v77_v38 }
 0x128   :  { %v78_v41 = vadd.f32 1e-05, %v74_v40 }
 0x12a   :  { %431 = vrsqrt.f32 %v78_v41 }
 0x12f   :  { %v426_v42 = vpop.eup %425 }
 0x130   :  { %v83_v43 = vmul.f32 %v426_v42, %v51_v12 }
 0x132   :  { %v93_v48 = vmul.f32 %v357_v44, %v83_v43 }
 0x133   :  { %v428_v45 = vpop.eup %427 }
 0x134   :  { %v430_v46 = vpop.eup %429  ;;  %v84_v47 = vmul.f32 %v428_v45, %v52_v20  ;;  %v103_v53 = vadd.f32 %v358_v49, %v93_v48 }
 0x135   :  { %v85_v50 = vmul.f32 %v430_v46, %v53_v13 }
 0x136   :  { %v94_v51 = vmul.f32 %v357_v44, %v84_v47 }
 0x137   :  { %v432_v52 = vpop.eup %431  ;;  %v95_v56 = vmul.f32 %v357_v44, %v85_v50 }
 0x138   :  { %v104_v54 = vadd.f32 %v358_v49, %v94_v51  ;;  %v86_v55 = vmul.f32 %v432_v52, %v54_v21 }
 0x139   :  { %v105_v59 = vadd.f32 %v358_v49, %v95_v56 }
 0x13a   :  { %v107_v57 = vpack.c.bf16 %v104_v54, %v103_v53  ;;  %v96_v58 = vmul.f32 %v357_v44, %v86_v55 }
 0x13c   :  { %391 = vmatprep.mubr.msk.bf16.mxu0 %vm33_vm0, %v107_v57  ;;  %v106_v60 = vadd.f32 %v358_v49, %v96_v58  ;;  %v364_v57 = vld [vmem:[%s587_s6] ss:$0 sm:$0xff] }
 0x13e   :  { %v108_v61 = vpack.c.bf16 %v106_v60, %v105_v59 }
 0x140   :  { %392 = vmatmul.mubr.msk.bf16.vlgmr.msra.gmra.mxu0 %vm33_vm0, %v108_v61 }
 0x200   :  { %v393_v11 = vpop.f32.mrf.mxu0 }
 0x201   :  { %v181_v12 = vadd.f32 %v393_v11, %v359_v10 }
 0x202   :  { %v172_v13 = vpop.f32.mrf.mxu0 }
 0x203   :  { %v189_v14 = vmul.f32 %v181_v12, %v181_v12  ;;  %v173_v15 = vadd.f32 %v359_v10, %v172_v13 }
 0x204   :  { %v394_v16 = vpop.f32.mrf.mxu0 }
 0x205   :  { %v193_v17 = vmul.f32 %v189_v14, %v181_v12  ;;  %v187_v18 = vmul.f32 %v173_v15, %v173_v15  ;;  %v184_v19 = vadd.f32 %v394_v16, %v359_v10 }
 0x206   :  { %v175_v20 = vpop.f32.mrf.mxu0 }
 0x207   :  { %v197_v21 = vmul.f32 0.044715, %v193_v17  ;;  %v191_v22 = vmul.f32 %v187_v18, %v173_v15  ;;  %v190_v23 = vmul.f32 %v184_v19, %v184_v19  ;;  %v176_v24 = vadd.f32 %v359_v10, %v175_v20 }
 0x209   :  { %v201_v25 = vadd.f32 %v197_v21, %v181_v12  ;;  %v195_v26 = vmul.f32 0.044715, %v191_v22  ;;  %v194_v27 = vmul.f32 %v190_v23, %v184_v19  ;;  %v188_v28 = vmul.f32 %v176_v24, %v176_v24 }
 0x20b   :  { %v205_v29 = vmul.f32 0.7978846, %v201_v25  ;;  %v199_v30 = vadd.f32 %v195_v26, %v173_v15  ;;  %v198_v31 = vmul.f32 0.044715, %v194_v27  ;;  %v192_v32 = vmul.f32 %v188_v28, %v176_v24 }
 0x20d   :  { %v202_v33 = vadd.f32 %v198_v31, %v184_v19  ;;  %v196_v34 = vmul.f32 0.044715, %v192_v32  ;;  %v203_v35 = vmul.f32 0.7978846, %v199_v30  ;;  %433 = vtanh.f32 %v205_v29 }
 0x20f   :  { %v206_v36 = vmul.f32 0.7978846, %v202_v33  ;;  %v200_v37 = vadd.f32 %v196_v34, %v176_v24  ;;  %435 = vtanh.f32 %v203_v35 }
 0x211   :  { %437 = vtanh.f32 %v206_v36  ;;  %v204_v38 = vmul.f32 0.7978846, %v200_v37 }
 0x213   :  { %439 = vtanh.f32 %v204_v38 }
 0x21a   :  { %v434_v39 = vpop.eup %433 }
 0x21b   :  { %v213_v43 = vadd.f32 1.0, %v434_v39 }
 0x21c   :  { %v436_v40 = vpop.eup %435 }
 0x21d   :  { %v211_v41 = vadd.f32 1.0, %v436_v40  ;;  %v217_v49 = vmul.f32 0.5, %v213_v43 }
 0x21e   :  { %v438_v42 = vpop.eup %437 }
 0x21f   :  { %v214_v44 = vadd.f32 1.0, %v438_v42  ;;  %v215_v47 = vmul.f32 0.5, %v211_v41  ;;  %v221_v54 = vmul.f32 %v217_v49, %v181_v12 }
 0x220   :  { %v440_v45 = vpop.eup %439 }
 0x221   :  { %v212_v46 = vadd.f32 1.0, %v440_v45  ;;  %v218_v48 = vmul.f32 0.5, %v214_v44  ;;  %v219_v52 = vmul.f32 %v215_v47, %v173_v15 }
 0x223   :  { %v216_v50 = vmul.f32 0.5, %v212_v46  ;;  %v222_v51 = vmul.f32 %v218_v48, %v184_v19 }
 0x225   :  { %v220_v53 = vmul.f32 %v216_v50, %v176_v24  ;;  %v224_v56 = vpack.c.bf16 %v222_v51, %v221_v54 }
 0x227   :  { %v223_v55 = vpack.c.bf16 %v220_v53, %v219_v52 }
 0x229   :  { %411 = vmatprep.mubr.bf16.mxu1 %v223_v55 }
 0x22a   :  { %412 = vmatmul.mubr.bf16.vlgmr.msra.gmra.mxu1 %v224_v56 }
 0x2ea   :  { %v413_v58 = vpop.f32.mrf.mxu1 }
 0x2eb   :  { %v339_v59 = vadd.f32 %v413_v58, %v364_v57 }
 0x2ec   :  { %v330_v60 = vpop.f32.mrf.mxu1 }
 0x2ed   :  { %v347_v61 = vadd.f32 %v339_v59, %v489_v1  ;;  %v331_v62 = vadd.f32 %v364_v57, %v330_v60 }
 0x2ee   :  { %v414_v63 = vpop.f32.mrf.mxu1 }
 0x2ef   :  { %351 = vst.msk [vmem:[%s588_s7 + $0x10] sm:$0xff] %vm33_vm0, %v347_v61  ;;  %v345_v3 = vadd.f32 %v331_v62, %v484_v0  ;;  %v342_v4 = vadd.f32 %v414_v63, %v364_v57 }
 0x2f0   :  { %v333_v6 = vpop.f32.mrf.mxu1 }
 0x2f1   :  { %349 = vst.msk [vmem:[%s588_s7] sm:$0xff] %vm33_vm0, %v345_v3  ;;  %v348_v7 = vadd.f32 %v342_v4, %v503_v5  ;;  %v334_v8 = vadd.f32 %v364_v57, %v333_v6 }
 0x2f3   :  { %352 = vst.msk [vmem:[%s588_s7 + $0x18] sm:$0xff] %vm33_vm0, %v348_v7  ;;  %v346_v1 = vadd.f32 %v334_v8, %v494_v2 }
 0x2f5   :  { %350 = vst.msk [vmem:[%s588_s7 + $0x8] sm:$0xff] %vm33_vm0, %v346_v1 }

// kernel: _lambda_.17
= control target key start
LH: loop header
LB: loop body
LE: loop exit
PB: predicated region body
PF: predicated region fallthrough
CT: control target
= control target key end

     0   :  { %vm37_vm0 = vcmask 261120   ;;  %s605_s0 = inlined_call_operand.vmem [shape: f32[32,32], index: 0, kind: input, shape index: {}]   ;;  %s606_s1 = inlined_call_operand.vmem [shape: f32[1,32], index: 1, kind: input, shape index: {}]   ;;  %s607_s2 = inlined_call_operand.vmem [shape: f32[1,32], index: 2, kind: input, shape index: {}]   ;;  %s608_s3 = inlined_call_operand.vmem [shape: bf16[32,256], index: 3, kind: input, shape index: {}]   ;;  %s609_s4 = inlined_call_operand.vmem [shape: f32[1,256], index: 4, kind: input, shape index: {}]   ;;  %s610_s5 = inlined_call_operand.vmem [shape: s32[32,1], index: 5, kind: input, shape index: {}]   ;;  %s611_s6 = inlined_call_operand.hbm [shape: f32[1,1], index: 6, kind: output, shape index: {}]  }
   0x1   :  { %v31_v0 = vld [vmem:[%s605_s0] sm:$0xff]  ;;  %v33_v1 = vld [vmem:[%s605_s0 + $0x10] sm:$0xff]  ;;  %v32_v2 = vld [vmem:[%s605_s0 + $0x8] sm:$0xff] }
   0x2   :  { %v38_v3 = vsel %vm37_vm0, %v31_v0, 0.0  ;;  %v44_v4 = vsel %vm37_vm0, %v33_v1, 0.0  ;;  %v34_v5 = vld [vmem:[%s605_s0 + $0x18] sm:$0xff] }
   0x3   :  { %39 = vadd.xlane.f32.xlu0 %v38_v3  ;;  %45 = vadd.xlane.f32.xlu1 %v44_v4 }
   0x4   :  { %11 = vsyncpa [#allocation4], 0  ;;  %v41_v6 = vsel %vm37_vm0, %v32_v2, 0.0  ;;  %v47_v7 = vsel %vm37_vm0, %v34_v5, 0.0  ;;  %v380_v28 = vld [vmem:[%s608_s3 + $0x14] ss:$8 sps:$4 sm:$0xff]  }
   0x5   :  { %v382_v29 = vld [vmem:[%s608_s3 + $0x10] ss:$8 sps:$4 sm:$0xff]   ;;  %v383_v30 = vld [vmem:[%s608_s3 + $0x4] ss:$8 sps:$4 sm:$0xff]   ;;  %167 = vmatprep.subr.bf16.mxu0 %v380_v28  ;;  %369 = vmatprep.subr.bf16.mxu1 %v380_v28  ;;  %v385_v31 = vld [vmem:[%s608_s3] ss:$8 sps:$4 sm:$0xff]  }
   0x6   :  { %168 = vmatpush1.bf16.msra.mxu0 %v382_v29  ;;  %371 = vmatpush1.bf16.msra.mxu1 %v382_v29  ;;  %v440_v32 = vmov 0   ;;  %v361_v47 = vld [vmem:[%s606_s1] ss:$0 sm:$0xff]  ;;  %v212_v28 = vld [vmem:[%s610_s5 + $0x8] sm:$0xff]  ;;  %vm320_vm9 = vcmask 7168   ;;  %vm29_vm10 = vcmask 0  }
   0x7   :  { %42 = vadd.xlane.f32.xlu0 %v41_v6  ;;  %48 = vadd.xlane.f32.xlu1 %v47_v7  ;;  %v362_v52 = vld [vmem:[%s607_s2] ss:$0 sm:$0xff]  ;;  %s442_s22 = smov [#allocation3]  }
   0x8   :  { %169 = vmatprep.subr.bf16.mxu0 %v383_v30  ;;  %187 = vmatprep.mubr.bf16.mxu0 %v440_v32  ;;  %v211_v29 = vld [vmem:[%s610_s5] sm:$0xff]  ;;  %s353_s23 = sshll.u32 %s442_s22, 4  ;;  %s354_s23 = int_to_ptr.vmem [resolvable:$true] %s353_s23 }
   0x9   :  { %370 = vmatprep.subr.bf16.mxu1 %v383_v30  ;;  %197 = vmatprep.mubr.bf16.mxu1 %v440_v32  ;;  %v213_v30 = vld [vmem:[%s610_s5 + $0x10] sm:$0xff]  ;;  %s418_s24 = scalar_lea.vmem %s354_s23, 16  ;;  %s422_s25 = scalar_lea.vmem %s354_s23, 32 }
   0xa   :  { %379 = vset.pattern.permute.xlu1 %v440_v32  ;;  %378 = vset.pattern.permute.xlu0 %v440_v32  ;;  %p419_p0 = scmp.ne.s32.totalorder %s354_s23, %s418_s24  ;;  %p423_p1 = scmp.lt.s32.totalorder %s354_s23, %s354_s23 }
   0xb   :  { %170 = vmatpush1.bf16.msra.mxu0 %v385_v31  ;;  %372 = vmatpush1.bf16.msra.mxu1 %v385_v31  ;;  %v214_v31 = vld [vmem:[%s610_s5 + $0x18] sm:$0xff]  ;;  %p424_p2 = scmp.lt.s32.totalorder %s422_s25, %s418_s24 }
   0xd   :  { %p425_p3 = por %p424_p2, %p423_p1 }
   0xf   :  { %p426_p4 = pnand %p425_p3, %p419_p0 }
  0x8c   :  { %v40_v8 = vpop.xlane.xlu0 %39  ;;  %v46_v9 = vpop.xlane.xlu1 %45 }
  0x8d   :  { %v51_v10 = vmul.f32 0.03125, %v40_v8  ;;  %v53_v11 = vmul.f32 0.03125, %v46_v9 }
  0x8f   :  { %v55_v12 = vsub.f32 %v31_v0, %v51_v10  ;;  %v57_v13 = vsub.f32 %v33_v1, %v53_v11  ;;  %v119_v1 = vlaneseq }
  0x90   :  { %v43_v14 = vpop.xlane.xlu0 %42  ;;  %v49_v15 = vpop.xlane.xlu1 %48 }
  0x91   :  { %v52_v16 = vmul.f32 0.03125, %v43_v14  ;;  %v54_v17 = vmul.f32 0.03125, %v49_v15  ;;  %v59_v18 = vmul.f32 %v55_v12, %v55_v12  ;;  %v61_v19 = vmul.f32 %v57_v13, %v57_v13 }
  0x93   :  { %v56_v20 = vsub.f32 %v32_v2, %v52_v16  ;;  %v58_v21 = vsub.f32 %v34_v5, %v54_v17  ;;  %v63_v22 = vsel %vm37_vm0, %v59_v18, 0.0  ;;  %v69_v23 = vsel %vm37_vm0, %v61_v19, 0.0  ;;  %v117_v5 = vld [vmem:[%s609_s4] sm:$0x3] }
  0x94   :  { %64 = vadd.xlane.f32.xlu0 %v63_v22  ;;  %v120_v2 = vshrl.u32 %v119_v1, 7 }
  0x95   :  { %v60_v24 = vmul.f32 %v56_v20, %v56_v20  ;;  %v62_v25 = vmul.f32 %v58_v21, %v58_v21 }
  0x96   :  { %v121_v3 = vsub.s32 0, %v120_v2  ;;  %v125_v4 = vsub.s32 1, %v120_v2 }
  0x97   :  { %v66_v26 = vsel %vm37_vm0, %v60_v24, 0.0  ;;  %v72_v27 = vsel %vm37_vm0, %v62_v25, 0.0 }
  0x98   :  { %70 = vadd.xlane.f32.xlu0 %v69_v23  ;;  %67 = vadd.xlane.f32.xlu1 %v66_v26  ;;  %v122_v6 = vrot.slane %v117_v5, %v121_v3  ;;  %v126_v7 = vrot.slane %v117_v5, %v125_v4 }
  0x9c   :  { %73 = vadd.xlane.f32.xlu1 %v72_v27 }
 0x11d   :  { %v65_v33 = vpop.xlane.xlu0 %64 }
 0x11e   :  { %v75_v34 = vmul.f32 0.03125, %v65_v33 }
 0x120   :  { %v79_v35 = vadd.f32 1e-05, %v75_v34 }
 0x121   :  { %v68_v36 = vpop.xlane.xlu1 %67  ;;  %v71_v37 = vpop.xlane.xlu0 %70 }
 0x122   :  { %386 = vrsqrt.f32 %v79_v35  ;;  %v76_v38 = vmul.f32 0.03125, %v68_v36  ;;  %v77_v39 = vmul.f32 0.03125, %v71_v37 }
 0x124   :  { %v80_v40 = vadd.f32 1e-05, %v76_v38  ;;  %v81_v41 = vadd.f32 1e-05, %v77_v39 }
 0x125   :  { %v74_v42 = vpop.xlane.xlu1 %73 }
 0x126   :  { %388 = vrsqrt.f32 %v80_v40  ;;  %v78_v43 = vmul.f32 0.03125, %v74_v42 }
 0x127   :  { %390 = vrsqrt.f32 %v81_v41 }
 0x128   :  { %v82_v44 = vadd.f32 1e-05, %v78_v43 }
 0x12a   :  { %392 = vrsqrt.f32 %v82_v44 }
 0x12f   :  { %v387_v45 = vpop.eup %386 }
 0x130   :  { %v87_v46 = vmul.f32 %v387_v45, %v55_v12 }
 0x132   :  { %v97_v51 = vmul.f32 %v361_v47, %v87_v46 }
 0x133   :  { %v389_v48 = vpop.eup %388 }
 0x134   :  { %v391_v49 = vpop.eup %390  ;;  %v88_v50 = vmul.f32 %v389_v48, %v56_v20  ;;  %v107_v56 = vadd.f32 %v362_v52, %v97_v51 }
 0x135   :  { %v89_v53 = vmul.f32 %v391_v49, %v57_v13 }
 0x136   :  { %v98_v54 = vmul.f32 %v361_v47, %v88_v50 }
 0x137   :  { %v393_v55 = vpop.eup %392  ;;  %v99_v59 = vmul.f32 %v361_v47, %v89_v53  ;;  %v209_v53 = vand.u32 127, %v119_v1 }
 0x138   :  { %v108_v57 = vadd.f32 %v362_v52, %v98_v54  ;;  %v90_v58 = vmul.f32 %v393_v55, %v58_v21 }
 0x139   :  { %v109_v62 = vadd.f32 %v362_v52, %v99_v59 }
 0x13a   :  { %v111_v60 = vpack.c.bf16 %v108_v57, %v107_v56  ;;  %v100_v61 = vmul.f32 %v361_v47, %v90_v58  ;;  %v210_v57 = vadd.s32 128, %v209_v53 }
 0x13c   :  { %367 = vmatmul.mubr.msk.bf16.vlgmr.msra.gmra.mxu0 %vm37_vm0, %v111_v60  ;;  %v110_v63 = vadd.f32 %v362_v52, %v100_v61 }
 0x13e   :  { %v112_v0 = vpack.c.bf16 %v110_v63, %v109_v62 }
 0x140   :  { %368 = vmatmul.mubr.msk.bf16.vlgmr.msra.gmra.mxu1 %vm37_vm0, %v112_v0 }
 0x1fc   :  { %v189_v8 = vpop.f32.mrf.mxu0 }
 0x1fd   :  { %v522_v10 = vadd.f32 %v189_v8, %v122_v6 }
 0x1fe   :  { %v191_v9 = vpop.f32.mrf.mxu0 }
 0x1ff   :  { %v524_v11 = vadd.f32 %v191_v9, %v126_v7 }
 0x200   :  { %v193_v12 = vpop.f32.mrf.mxu0  ;;  %v199_v13 = vpop.f32.mrf.mxu1 }
 0x201   :  { %v255_v14 = vmax.f32 %v522_v10, %v524_v11  ;;  %v528_v17 = vadd.f32 %v193_v12, %v122_v6  ;;  %v530_v18 = vadd.f32 %v199_v13, %v122_v6 }
 0x202   :  { %v195_v15 = vpop.f32.mrf.mxu0  ;;  %v201_v16 = vpop.f32.mrf.mxu1 }
 0x203   :  { %v532_v19 = vadd.f32 %v195_v15, %v126_v7  ;;  %v534_v20 = vadd.f32 %v201_v16, %v126_v7  ;;  %256 = vmax.xlane.f32.xlu0 %v255_v14 }
 0x204   :  { %v203_v21 = vpop.f32.mrf.mxu1 }
 0x205   :  { %v258_v22 = vmax.f32 %v528_v17, %v532_v19  ;;  %v261_v23 = vmax.f32 %v530_v18, %v534_v20  ;;  %v540_v25 = vadd.f32 %v203_v21, %v122_v6 }
 0x206   :  { %v205_v24 = vpop.f32.mrf.mxu1 }
 0x207   :  { %v542_v26 = vadd.f32 %v205_v24, %v126_v7  ;;  %259 = vmax.xlane.f32.xlu1 %v258_v22  ;;  %262 = vmax.xlane.f32.xlu0 %v261_v23 }
 0x209   :  { %v264_v27 = vmax.f32 %v540_v25, %v542_v26 }
 0x20b   :  { %265 = vmax.xlane.f32.xlu1 %v264_v27 }
 0x21c   :  { %219 = vperm.xlu1 %379, %v212_v28  }
 0x21d   :  { %216 = vperm.xlu0 %378, %v211_v29  }
 0x220   :  { %222 = vperm.xlu1 %379, %v213_v30  }
 0x224   :  { %225 = vperm.xlu1 %379, %v214_v31  }
 0x28c   :  { %v558_v32 = vpop.xlane.xlu0 %256 }
 0x28d   :  { %v267_v33 = vsub.f32 %v522_v10, %v558_v32  ;;  %v268_v34 = vsub.f32 %v524_v11, %v558_v32 }
 0x28f   :  { %v275_v35 = vmul.f32 1.442695, %v267_v33  ;;  %v277_v36 = vmul.f32 1.442695, %v268_v34 }
 0x290   :  { %v564_v37 = vpop.xlane.xlu1 %259  ;;  %v566_v38 = vpop.xlane.xlu0 %262 }
 0x291   :  { %394 = vpow2.f32 %v275_v35  ;;  %v269_v39 = vsub.f32 %v528_v17, %v564_v37  ;;  %v270_v40 = vsub.f32 %v532_v19, %v564_v37  ;;  %v271_v41 = vsub.f32 %v530_v18, %v566_v38 }
 0x292   :  { %396 = vpow2.f32 %v277_v36  ;;  %v272_v42 = vsub.f32 %v534_v20, %v566_v38 }
 0x293   :  { %v279_v43 = vmul.f32 1.442695, %v269_v39  ;;  %v281_v44 = vmul.f32 1.442695, %v270_v40  ;;  %v283_v45 = vmul.f32 1.442695, %v271_v41 }
 0x294   :  { %v285_v46 = vmul.f32 1.442695, %v272_v42  ;;  %v576_v47 = vpop.xlane.xlu1 %265 }
 0x295   :  { %398 = vpow2.f32 %v279_v43  ;;  %v273_v48 = vsub.f32 %v540_v25, %v576_v47  ;;  %v274_v49 = vsub.f32 %v542_v26, %v576_v47 }
 0x296   :  { %400 = vpow2.f32 %v281_v44 }
 0x297   :  { %402 = vpow2.f32 %v283_v45  ;;  %v287_v50 = vmul.f32 1.442695, %v273_v48  ;;  %v289_v51 = vmul.f32 1.442695, %v274_v49 }
 0x298   :  { %404 = vpow2.f32 %v285_v46  ;;  %v220_v52 = vpop.permute.xlu1 %219  ;;  %v217_v0 = vpop.permute.xlu0 %216 }
 0x299   :  { %406 = vpow2.f32 %v287_v50  ;;  %vm227_vm3 = vcmp.eq.s32.totalorder %v209_v53, %v217_v0  ;;  %vm228_vm4 = vcmp.eq.s32.totalorder %v210_v57, %v217_v0  ;;  %vm229_vm5 = vcmp.eq.s32.totalorder %v209_v53, %v220_v52 }
 0x29a   :  { %408 = vpow2.f32 %v289_v51  ;;  %v235_v8 = vsel %vm227_vm3, %v522_v10, 0.0  ;;  %v236_v9 = vsel %vm228_vm4, %v524_v11, 0.0  ;;  %vm230_vm6 = vcmp.eq.s32.totalorder %v210_v57, %v220_v52 }
 0x29b   :  { %v243_v13 = vadd.f32 %v236_v9, %v235_v8  ;;  %v237_v14 = vsel %vm229_vm5, %v528_v17, 0.0  ;;  %v238_v15 = vsel %vm230_vm6, %v532_v19, 0.0  ;;  %v441_v50 = vmov 0.0  }
 0x29c   :  { %v223_v56 = vpop.permute.xlu1 %222  ;;  %v246_v16 = vadd.f32 %v238_v15, %v237_v14  ;;  %30 = vst.msk [vmem:[#allocation2] sm:$0x1] %vm29_vm10, %v441_v50 }
 0x29d   :  { %vm231_vm1 = vcmp.eq.s32.totalorder %v209_v53, %v223_v56  ;;  %vm232_vm2 = vcmp.eq.s32.totalorder %v210_v57, %v223_v56 }
 0x29e   :  { %v395_v54 = vpop.eup %394  ;;  %v239_v2 = vsel %vm231_vm1, %v530_v18, 0.0  ;;  %v240_v3 = vsel %vm232_vm2, %v534_v20, 0.0 }
 0x29f   :  { %v397_v55 = vpop.eup %396  ;;  %v249_v6 = vadd.f32 %v240_v3, %v239_v2 }
 0x2a0   :  { %v291_v58 = vadd.f32 %v397_v55, %v395_v54  ;;  %v226_v12 = vpop.permute.xlu1 %225 }
 0x2a1   :  { %vm233_vm7 = vcmp.eq.s32.totalorder %v209_v53, %v226_v12  ;;  %vm234_vm8 = vcmp.eq.s32.totalorder %v210_v57, %v226_v12 }
 0x2a2   :  { %v399_v59 = vpop.eup %398  ;;  %292 = vadd.xlane.f32.xlu1 %v291_v58  ;;  %v241_v18 = vsel %vm233_vm7, %v540_v25, 0.0  ;;  %v242_v20 = vsel %vm234_vm8, %v542_v26, 0.0 }
 0x2a3   :  { %v401_v60 = vpop.eup %400  ;;  %v252_v10 = vadd.f32 %v242_v20, %v241_v18 }
 0x2a4   :  { %v403_v61 = vpop.eup %402  ;;  %v294_v62 = vadd.f32 %v401_v60, %v399_v59 }
 0x2a5   :  { %v405_v63 = vpop.eup %404 }
 0x2a6   :  { %v407_v4 = vpop.eup %406  ;;  %295 = vadd.xlane.f32.xlu0 %v294_v62  ;;  %v297_v1 = vadd.f32 %v405_v63, %v403_v61 }
 0x2a7   :  { %v409_v5 = vpop.eup %408 }
 0x2a8   :  { %298 = vadd.xlane.f32.xlu1 %v297_v1  ;;  %v300_v7 = vadd.f32 %v409_v5, %v407_v4 }
 0x2aa   :  { %250 = vadd.xlane.f32.xlu0 %v249_v6 }
 0x2ac   :  { %301 = vadd.xlane.f32.xlu1 %v300_v7 }
 0x2b0   :  { %244 = vadd.xlane.f32.xlu1 %v243_v13 }
 0x2b4   :  { %247 = vadd.xlane.f32.xlu1 %v246_v16 }
 0x2b8   :  { %253 = vadd.xlane.f32.xlu1 %v252_v10 }
 0x32b   :  { %v293_v11 = vpop.xlane.xlu1 %292 }
 0x32c   :  { %410 = vlog2.f32 %v293_v11 }
 0x32f   :  { %v296_v21 = vpop.xlane.xlu0 %295 }
 0x330   :  { %412 = vlog2.f32 %v296_v21 }
 0x331   :  { %v299_v22 = vpop.xlane.xlu1 %298 }
 0x332   :  { %414 = vlog2.f32 %v299_v22 }
 0x333   :  { %v251_v39 = vpop.xlane.xlu0 %250 }
 0x335   :  { %v302_v17 = vpop.xlane.xlu1 %301 }
 0x336   :  { %416 = vlog2.f32 %v302_v17 }
 0x339   :  { %v411_v19 = vpop.eup %410  ;;  %v245_v24 = vpop.xlane.xlu1 %244 }
 0x33a   :  { %v304_v23 = vmul.f32 0.6931472, %v411_v19 }
 0x33c   :  { %v311_v27 = vadd.f32 %v304_v23, %v558_v32 }
 0x33d   :  { %v413_v28 = vpop.eup %412  ;;  %v248_v33 = vpop.xlane.xlu1 %247 }
 0x33e   :  { %v306_v25 = vmul.f32 0.6931472, %v413_v28  ;;  %v316_v30 = vsub.f32 %v311_v27, %v245_v24 }
 0x33f   :  { %v415_v29 = vpop.eup %414 }
 0x340   :  { %v308_v26 = vmul.f32 0.6931472, %v415_v29  ;;  %v312_v31 = vadd.f32 %v306_v25, %v564_v37  ;;  %v321_v42 = vsel %vm320_vm9, %v316_v30, 0.0 }
 0x341   :  { %v254_v46 = vpop.xlane.xlu1 %253 }
 0x342   :  { %v313_v34 = vadd.f32 %v308_v26, %v566_v38  ;;  %v317_v35 = vsub.f32 %v312_v31, %v248_v33 }
 0x343   :  { %v417_v36 = vpop.eup %416 }
 0x344   :  { %v310_v40 = vmul.f32 0.6931472, %v417_v36  ;;  %v318_v41 = vsub.f32 %v313_v34, %v251_v39  ;;  %v322_v32 = vsel %vm320_vm9, %v317_v35, 0.0 }
 0x345   :  { %v323_v43 = vadd.f32 %v322_v32, %v321_v42 }
 0x346   :  { %v324_v44 = vsel %vm320_vm9, %v318_v41, 0.0  ;;  %v314_v45 = vadd.f32 %v310_v40, %v576_v47  ;;  %v315_v47 = vld [vmem:[#allocation2] sm:$0x1] }
 0x347   :  { %v325_v37 = vadd.f32 %v324_v44, %v323_v43 }
 0x348   :  { %v319_v48 = vsub.f32 %v314_v45, %v254_v46 }
 0x34a   :  { %v326_v49 = vsel %vm320_vm9, %v319_v48, 0.0 }
 0x34b   :  { %v327_v38 = vadd.f32 %v326_v49, %v325_v37 }
 0x34d   :  { %328 = vadd.xlane.f32.xlu0 %v327_v38 }
 0x3d6   :  { %v329_v51 = vpop.xlane.xlu0 %328 }
 0x3d7   :  { %v330_v52 = vrot.slane %v329_v51, 4 }
 0x3d9   :  { %v331_v53 = vadd.f32 %v330_v52, %v329_v51 }
 0x3db   :  { %v332_v54 = vrot.slane %v331_v53, 2 }
 0x3dd   :  { %v333_v55 = vadd.f32 %v332_v54, %v331_v53 }
 0x3df   :  { %v334_v56 = vrot.slane %v333_v55, 1 }
 0x3e1   :  { %v335_v57 = vadd.f32 %v334_v56, %v333_v55 }
 0x3e3   :  { %373 = vpush %v335_v57 }
 0x414   :  { %s374_s5 = spop %373 }
 0x415   :  { %v337_v58 = vstv %s374_s5 }
 0x416   :  { %v338_v59 = vadd.f32 %v337_v58, %v315_v47 }
 0x418   :  { %340 = vst.msk [vmem:[#allocation2] sm:$0x1] %vm29_vm10, %v338_v59 }
 0x41f   :  { %v344_v60 = vld [vmem:[#allocation2] sm:$0x1] }
 0x420   :  { %v345_v61 = vmul.f32 0.03125, %v344_v60 }
 0x422   :  { %346 = vst.msk [vmem:[#allocation3] sm:$0x1] %vm29_vm10, %v345_v61 }
 0x423   :  { %429 = shalt.err (!%p426_p4)
}
 0x424   :  { %356 = dma.vmem_to_hbm [thread:$0]  %s354_s23, 16, %s611_s6, [#allocation4]  }
 0x425   :  { %438 = dma.done.wait [#allocation4], 16  }
 0x426   :  { %439 = vsyncadd [#allocation4], 4294967280 }
 0x427   :  { %360 = vsyncpa [#allocation4], 1 }

</bundles_post_ra>
